<compile_context>
chip_gen: v5e
topology: v5e:2x2
jax: 0.10.0
libtpu: 0.0.40
codegen_flags: <defaults>
</compile_context>

<pallas_src>
import functools
import math

import jax
import jax.numpy as jnp
from jax.experimental import pallas as pl
from jax.experimental.pallas import tpu as pltpu

_LN_EPS = 1e-6  # the module constructs every LayerNorm with eps=1e-06


def _layernorm(x, w, b):
    # PyTorch LayerNorm semantics: biased variance, eps inside rsqrt, affine.
    mu = jnp.mean(x, axis=-1, keepdims=True)
    var = jnp.mean((x - mu) ** 2, axis=-1, keepdims=True)
    return (x - mu) * jax.lax.rsqrt(var + _LN_EPS) * w + b


# ----------------------- kernel 1: ln_1 + QKV + q/k norm -----------------------

def _qkv_kernel(x_ref, ln1_w_ref, ln1_b_ref, hred_ref, hbcast_ref,
                qg_ref, qb_ref, kg_ref, kb_ref, wqkv_ref,
                q_out_ref, k_out_ref, v_out_ref, *, width):
    x = x_ref[0].astype(jnp.float32)                           # (tile_n, W)
    h1 = _layernorm(x, ln1_w_ref[0], ln1_b_ref[0])

    # Fused QKV projection (bias-free), bf16 inputs, f32 accumulation.
    qkv = jnp.dot(h1.astype(jnp.bfloat16), wqkv_ref[...],
                  preferred_element_type=jnp.float32)          # (tile_n, 3W)
    q = qkv[:, :width]
    k = qkv[:, width:2 * width]
    v = qkv[:, 2 * width:]
    v_out_ref[0] = v.astype(v_out_ref.dtype)

    hred = hred_ref[...]        # (W, heads): per-head mean reducer (1/d weights)
    hbcast = hbcast_ref[...]    # (heads, W): broadcast stats back to width

    def head_stats(t):
        red = jnp.dot(t, hred, preferred_element_type=jnp.float32)
        return jnp.dot(red, hbcast, preferred_element_type=jnp.float32)

    def head_layernorm(t, g, b):
        mu = head_stats(t)
        var = head_stats(t * t) - mu * mu                      # biased variance
        return (t - mu) * jax.lax.rsqrt(var + _LN_EPS) * g + b

    q_out_ref[0] = head_layernorm(q, qg_ref[0], qb_ref[0]).astype(q_out_ref.dtype)
    k_out_ref[0] = head_layernorm(k, kg_ref[0], kb_ref[0]).astype(k_out_ref.dtype)


# ------------- kernel 2: attention + c_proj + residual + ln_2 + MLP ------------

def _attn_mlp_kernel(x_ref, q_ref, k_ref, v_ref,
                     bo_ref, ln2_w_ref, ln2_b_ref, bfc_ref, bp2_ref,
                     wo_ref, wfc_ref, wp2_ref,
                     out_ref, attn_acc_ref, *, heads, head_dim):
    scale = 1.0 / math.sqrt(head_dim)
    q = q_ref[0]                                               # (tile_n, W) bf16
    k = k_ref[0]                                               # (n_ctx, W)  bf16
    v = v_ref[0]                                               # (n_ctx, W)  bf16

    for h in range(heads):                                     # static unroll
        sl = slice(h * head_dim, (h + 1) * head_dim)
        qh, kh, vh = q[:, sl], k[:, sl], v[:, sl]
        s = jax.lax.dot_general(qh, kh, (((1,), (1,)), ((), ())),
                                preferred_element_type=jnp.float32) * scale
        s = s - jnp.max(s, axis=-1, keepdims=True)
        p = jnp.exp(s)
        p = p * pl.reciprocal(jnp.sum(p, axis=-1, keepdims=True), approx=True)
        # Write each head's output in place (no concatenate).
        attn_acc_ref[:, sl] = jnp.dot(p.astype(jnp.bfloat16), vh,
                                      preferred_element_type=jnp.float32)

    x = x_ref[0].astype(jnp.float32)
    attn = attn_acc_ref[...]
    proj = jnp.dot(attn.astype(jnp.bfloat16), wo_ref[...],
                   preferred_element_type=jnp.float32) + bo_ref[0]
    y = x + proj                                               # first residual

    h2 = _layernorm(y, ln2_w_ref[0], ln2_b_ref[0])
    hid = jnp.dot(h2.astype(jnp.bfloat16), wfc_ref[...],
                  preferred_element_type=jnp.float32) + bfc_ref[0]
    # TODO(synk): tanh-approximate GELU (EUP-friendly) instead of nn.GELU()'s
    # exact erf; max abs deviation ~3e-4, well inside the test tolerance.
    hid = jax.nn.gelu(hid, approximate=True)
    m = jnp.dot(hid.astype(jnp.bfloat16), wp2_ref[...],
                preferred_element_type=jnp.float32) + bp2_ref[0]
    out_ref[0] = (y + m).astype(out_ref.dtype)                 # second residual


# ------------------------------------ wrapper ----------------------------------

def _vmem_limit(nbytes):
    # Enough scoped VMEM for the actual tile budget (with slack), capped at
    # 64 MiB so the request stays valid on every TPU generation.
    return int(min(64 * 1024 * 1024, max(32 * 1024 * 1024, int(1.5 * nbytes))))


def residual_attention_block(x, params, *, heads, tile_n=None):
    """x: (B, n_ctx, width).  params: PyTorch-layout parameter dict."""
    B, N, W = x.shape
    assert W % heads == 0
    d = W // heads

    if tile_n is None:
        tile_n = N
        for cand in (256, 128, 64, 32, 16):
            if N % cand == 0:
                tile_n = cand
                break
    assert N % tile_n == 0
    assert tile_n == N or tile_n % 16 == 0   # respect bf16 (16, 128) tiling
    nt = N // tile_n
    wdt = jnp.bfloat16

    # ---- re-layout torch parameters for the kernels ---------------------------
    # c_qkv.weight rows are ordered (head, {q,k,v}, d); regroup them so a single
    # x @ Wqkv yields [q | k | v], each with head-major columns (h*d + j).
    wqkv = params["Wqkv"].reshape(heads, 3, d, W).transpose(1, 0, 2, 3)
    wqkv = wqkv.reshape(3 * W, W).T.astype(wdt)                 # (W, 3W)
    wo = params["Wo"].T.astype(wdt)                             # (W, W)
    wfc = params["Wfc"].T.astype(wdt)                           # (W, 4W)
    wp2 = params["Wp2"].T.astype(wdt)                           # (4W, W)

    # Per-head LayerNorm helpers: reduce (1/d) and broadcast matrices.
    col_head = jnp.arange(W) // d
    hred = (col_head[:, None] == jnp.arange(heads)[None, :]).astype(jnp.float32) / d
    hbcast = (jnp.arange(heads)[:, None] == col_head[None, :]).astype(jnp.float32)

    r2 = lambda a: a.reshape(1, -1).astype(jnp.float32)
    tile_head = lambda a: jnp.tile(a, heads).reshape(1, W).astype(jnp.float32)

    ln1_w, ln1_b = r2(params["ln1_w"]), r2(params["ln1_b"])
    ln2_w, ln2_b = r2(params["ln2_w"]), r2(params["ln2_b"])
    qg, qb = tile_head(params["qn_w"]), tile_head(params["qn_b"])
    kg, kb = tile_head(params["kn_w"]), tile_head(params["kn_b"])
    bo, bfc, bp2 = r2(params["bo"]), r2(params["bfc"]), r2(params["bp2"])

    itemx = x.dtype.itemsize
    grid = (B, nt)

    # Rough VMEM / cost numbers (advisory only).
    vmem1 = (2 * tile_n * W * (itemx + 3 * 2)
             + 2 * (3 * W * W * 2 + 2 * W * heads * 4)
             + 6 * tile_n * W * 4)
    vmem2 = (2 * tile_n * W * (2 * itemx + 2)
             + 4 * N * W * 2
             + 2 * 9 * W * W * 2
             + tile_n * W * 4
             + tile_n * (4 * W + N) * 4 + 8 * W * 4)
    flops1 = 2 * B * N * W * 3 * W + 8 * B * N * W * heads
    bytes1 = B * N * W * (itemx + 3 * 2) + 3 * W * W * 2
    trans1 = B * N * (1 + 2 * heads)
    flops2 = 4 * B * N * N * W + 18 * B * N * W * W
    bytes2 = B * N * W * (2 * itemx + 2) + nt * B * N * W * 4 + 9 * W * W * 2
    trans2 = B * heads * N * N + B * N * 4 * W + B * N

    def run(single_buffer_weights):
        wkw = {"pipeline_mode": pl.Buffered(1)} if single_buffer_weights else {}

        def wspec(shape):       # grid-invariant weights
            return pl.BlockSpec(shape, lambda b, n: (0,) * len(shape), **wkw)

        def pspec(shape):       # small (1, X) parameter rows
            return pl.BlockSpec(shape, lambda b, n: (0,) * len(shape))

        row_spec = pl.BlockSpec((1, tile_n, W), lambda b, n: (b, n, 0))
        seq_spec = pl.BlockSpec((1, N, W), lambda b, n: (b, 0, 0))

        # ---- kernel 1: ln_1 + fused QKV + per-head q/k LayerNorm ----
        q_n, k_n, v_n = pl.pallas_call(
            functools.partial(_qkv_kernel, width=W),
            grid=grid,
            in_specs=[row_spec,
                      pspec((1, W)), pspec((1, W)),
                      wspec((W, heads)), wspec((heads, W)),
                      pspec((1, W)), pspec((1, W)), pspec((1, W)), pspec((1, W)),
                      wspec((W, 3 * W))],
            out_specs=[row_spec, row_spec, row_spec],
            out_shape=[jax.ShapeDtypeStruct((B, N, W), jnp.bfloat16)] * 3,
            compiler_params=pltpu.CompilerParams(
                dimension_semantics=("parallel", "parallel"),
                vmem_limit_bytes=_vmem_limit(vmem1)),
            cost_estimate=pl.CostEstimate(
                flops=flops1, transcendentals=trans1, bytes_accessed=bytes1),
        )(x, ln1_w, ln1_b, hred, hbcast, qg, qb, kg, kb, wqkv)

        # ---- kernel 2: attention + c_proj + residual + ln_2 + MLP + residual ----
        out = pl.pallas_call(
            functools.partial(_attn_mlp_kernel, heads=heads, head_dim=d),
            grid=grid,
            in_specs=[row_spec, row_spec, seq_spec, seq_spec,
                      pspec((1, W)), pspec((1, W)), pspec((1, W)),
                      pspec((1, 4 * W)), pspec((1, W)),
                      wspec((W, W)), wspec((W, 4 * W)), wspec((4 * W, W))],
            out_specs=row_spec,
            out_shape=jax.ShapeDtypeStruct((B, N, W), x.dtype),
            scratch_shapes=[pltpu.VMEM((tile_n, W), jnp.float32)],
            compiler_params=pltpu.CompilerParams(
                dimension_semantics=("parallel", "parallel"),
                vmem_limit_bytes=_vmem_limit(vmem2)),
            cost_estimate=pl.CostEstimate(
                flops=flops2, transcendentals=trans2, bytes_accessed=bytes2),
        )(x, q_n, k_n, v_n, bo, ln2_w, ln2_b, bfc, bp2, wo, wfc, wp2)
        return jax.block_until_ready(out)

    try:
        return run(True)
    except Exception:
        # pl.Buffered(1) single-buffered weights not supported by this build;
        # fall back to default double-buffered weights (identical semantics).
        return run(False)


# ------------------------ pure-JAX reference (torch semantics) ------------------

def reference(x, p, *, heads):
    B, N, W = x.shape
    d = W // heads

    def ln(t, w, b):
        mu = jnp.mean(t, axis=-1, keepdims=True)
        var = jnp.mean((t - mu) ** 2, axis=-1, keepdims=True)
        return (t - mu) * jax.lax.rsqrt(var + _LN_EPS) * w + b

    h1 = ln(x, p["ln1_w"], p["ln1_b"])
    qkv = h1 @ p["Wqkv"].T
    qkv = qkv.reshape(B, N, heads, 3 * d)
    q, k, v = qkv[..., :d], qkv[..., d:2 * d], qkv[..., 2 * d:]
    q = ln(q, p["qn_w"], p["qn_b"])
    k = ln(k, p["kn_w"], p["kn_b"])
    q, k, v = (jnp.swapaxes(t, 1, 2) for t in (q, k, v))        # (B, H, N, d)
    s = jnp.einsum("bhnd,bhmd->bhnm", q, k) / math.sqrt(d)
    a = jax.nn.softmax(s, axis=-1)
    o = jnp.einsum("bhnm,bhmd->bhnd", a, v)
    o = jnp.swapaxes(o, 1, 2).reshape(B, N, W)
    o = o @ p["Wo"].T + p["bo"]
    y = x + o
    h2 = ln(y, p["ln2_w"], p["ln2_b"])
    hid = jax.nn.gelu(h2 @ p["Wfc"].T + p["bfc"], approximate=False)
    return y + hid @ p["Wp2"].T + p["bp2"]


# -------------------------------------- main ------------------------------------

if __name__ == "__main__":
    # Small shapes consistent with the module (bs, n_ctx, width); tile_n=16 gives
    # a 2x2 grid so the n_ctx tiling path is actually exercised.
    B, N, W, heads = 2, 32, 32, 4
    d = W // heads

    key = jax.random.PRNGKey(0)
    ks = jax.random.split(key, 16)
    nrm = lambda k, s, sc=0.02: sc * jax.random.normal(k, s, jnp.float32)

    params = {
        "Wqkv": nrm(ks[0], (3 * W, W)),          # c_qkv.weight (bias=False)
        "Wo":   nrm(ks[1], (W, W)),              # attn c_proj.weight
        "bo":   nrm(ks[2], (W,)),
        "Wfc":  nrm(ks[3], (4 * W, W)),          # mlp c_fc.weight
        "bfc":  nrm(ks[4], (4 * W,)),
        "Wp2":  nrm(ks[5], (W, 4 * W)),          # mlp c_proj.weight
        "bp2":  nrm(ks[6], (W,)),
        "ln1_w": 1.0 + nrm(ks[7], (W,), 0.05),
        "ln1_b": nrm(ks[8], (W,), 0.05),
        "ln2_w": 1.0 + nrm(ks[9], (W,), 0.05),
        "ln2_b": nrm(ks[10], (W,), 0.05),
        "qn_w": 1.0 + nrm(ks[11], (d,), 0.05),
        "qn_b": nrm(ks[12], (d,), 0.05),
        "kn_w": 1.0 + nrm(ks[13], (d,), 0.05),
        "kn_b": nrm(ks[14], (d,), 0.05),
    }
    x = jax.random.normal(ks[15], (B, N, W), jnp.float32)

    out = residual_attention_block(x, params, heads=heads, tile_n=16)
    out = jax.block_until_ready(out)

    ref = reference(x, params, heads=heads)
    assert out.shape == (B, N, W) and out.dtype == x.dtype
    err = float(jnp.max(jnp.abs(out - ref)))
    # Tolerance covers bf16 matmul inputs (f32 accumulation), tanh GELU and the
    # approximate softmax reciprocal; typical max-abs error is ~1e-3.
    assert err < 1e-2, err
    print("KERNEL_OK")
</pallas_src>

<mosaic_0001>
module attributes {stable_mosaic.version = 11 : i64} {
  func.func @_qkv_kernel(%arg0: i32, %arg1: i32, %arg2: memref<1x16x32xf32, #tpu.memory_space<vmem>>, %arg3: memref<1x32xf32, #tpu.memory_space<vmem>>, %arg4: memref<1x32xf32, #tpu.memory_space<vmem>>, %arg5: memref<32x4xf32, #tpu.memory_space<vmem>>, %arg6: memref<4x32xf32, #tpu.memory_space<vmem>>, %arg7: memref<1x32xf32, #tpu.memory_space<vmem>>, %arg8: memref<1x32xf32, #tpu.memory_space<vmem>>, %arg9: memref<1x32xf32, #tpu.memory_space<vmem>>, %arg10: memref<1x32xf32, #tpu.memory_space<vmem>>, %arg11: memref<32x96xbf16, #tpu.memory_space<vmem>>, %arg12: memref<1x16x32xbf16, #tpu.memory_space<vmem>>, %arg13: memref<1x16x32xbf16, #tpu.memory_space<vmem>>, %arg14: memref<1x16x32xbf16, #tpu.memory_space<vmem>>) attributes {dimension_semantics = [#tpu.dimension_semantics<parallel>, #tpu.dimension_semantics<parallel>], iteration_bounds = array<i64: 2, 2>, scalar_prefetch = 0 : i64, scratch_operands = 0 : i64, tpu.core_type = #tpu.core_type<tc>, window_params = [{transform_indices = @transform_0, window_bounds = array<i64: 1, 16, 32>}, {pipeline_mode = #tpu.pipeline_mode<synchronous>, transform_indices = @transform_1, window_bounds = array<i64: 1, 32>}, {pipeline_mode = #tpu.pipeline_mode<synchronous>, transform_indices = @transform_2, window_bounds = array<i64: 1, 32>}, {pipeline_mode = #tpu.pipeline_mode<synchronous>, transform_indices = @transform_3, window_bounds = array<i64: 32, 4>}, {pipeline_mode = #tpu.pipeline_mode<synchronous>, transform_indices = @transform_4, window_bounds = array<i64: 4, 32>}, {pipeline_mode = #tpu.pipeline_mode<synchronous>, transform_indices = @transform_5, window_bounds = array<i64: 1, 32>}, {pipeline_mode = #tpu.pipeline_mode<synchronous>, transform_indices = @transform_6, window_bounds = array<i64: 1, 32>}, {pipeline_mode = #tpu.pipeline_mode<synchronous>, transform_indices = @transform_7, window_bounds = array<i64: 1, 32>}, {pipeline_mode = #tpu.pipeline_mode<synchronous>, transform_indices = @transform_8, window_bounds = array<i64: 1, 32>}, {pipeline_mode = #tpu.pipeline_mode<synchronous>, transform_indices = @transform_9, window_bounds = array<i64: 32, 96>}, {transform_indices = @transform_10, window_bounds = array<i64: 1, 16, 32>}, {transform_indices = @transform_11, window_bounds = array<i64: 1, 16, 32>}, {transform_indices = @transform_12, window_bounds = array<i64: 1, 16, 32>}]} {
    %c0 = arith.constant 0 : index
    %c0_0 = arith.constant 0 : index
    %c0_1 = arith.constant 0 : index
    %0 = vector.load %arg2[%c0, %c0_0, %c0_1] : memref<1x16x32xf32, #tpu.memory_space<vmem>>, vector<1x16x32xf32>
    %1 = vector.shape_cast %0 : vector<1x16x32xf32> to vector<16x32xf32>
    %c0_2 = arith.constant 0 : index
    %c0_3 = arith.constant 0 : index
    %2 = vector.load %arg3[%c0_2, %c0_3] : memref<1x32xf32, #tpu.memory_space<vmem>>, vector<1x32xf32>
    %3 = vector.shape_cast %2 : vector<1x32xf32> to vector<32xf32>
    %c0_4 = arith.constant 0 : index
    %c0_5 = arith.constant 0 : index
    %4 = vector.load %arg4[%c0_4, %c0_5] : memref<1x32xf32, #tpu.memory_space<vmem>>, vector<1x32xf32>
    %5 = vector.shape_cast %4 : vector<1x32xf32> to vector<32xf32>
    %cst = arith.constant dense<0.000000e+00> : vector<16xf32>
    %6 = vector.multi_reduction <add>, %1, %cst [1] : vector<16x32xf32> to vector<16xf32>
    %7 = vector.shape_cast %6 : vector<16xf32> to vector<16x1xf32>
    %cst_6 = arith.constant 3.200000e+01 : f32
    %8 = vector.broadcast %cst_6 : f32 to vector<16x1xf32>
    %9 = arith.divf %7, %8 : vector<16x1xf32>
    %10 = vector.broadcast %9 : vector<16x1xf32> to vector<16x32xf32>
    %11 = arith.subf %1, %10 : vector<16x32xf32>
    %12 = arith.mulf %11, %11 : vector<16x32xf32>
    %cst_7 = arith.constant dense<0.000000e+00> : vector<16xf32>
    %13 = vector.multi_reduction <add>, %12, %cst_7 [1] : vector<16x32xf32> to vector<16xf32>
    %14 = vector.shape_cast %13 : vector<16xf32> to vector<16x1xf32>
    %cst_8 = arith.constant 3.200000e+01 : f32
    %15 = vector.broadcast %cst_8 : f32 to vector<16x1xf32>
    %16 = arith.divf %14, %15 : vector<16x1xf32>
    %17 = vector.broadcast %9 : vector<16x1xf32> to vector<16x32xf32>
    %18 = arith.subf %1, %17 : vector<16x32xf32>
    %cst_9 = arith.constant 9.99999997E-7 : f32
    %19 = vector.broadcast %cst_9 : f32 to vector<16x1xf32>
    %20 = arith.addf %16, %19 : vector<16x1xf32>
    %21 = math.rsqrt %20 : vector<16x1xf32>
    %22 = vector.broadcast %21 : vector<16x1xf32> to vector<16x32xf32>
    %23 = arith.mulf %18, %22 : vector<16x32xf32>
    %24 = vector.shape_cast %3 : vector<32xf32> to vector<1x32xf32>
    %25 = vector.broadcast %24 : vector<1x32xf32> to vector<16x32xf32>
    %26 = arith.mulf %23, %25 : vector<16x32xf32>
    %27 = vector.shape_cast %5 : vector<32xf32> to vector<1x32xf32>
    %28 = vector.broadcast %27 : vector<1x32xf32> to vector<16x32xf32>
    %29 = arith.addf %26, %28 : vector<16x32xf32>
    %30 = arith.truncf %29 : vector<16x32xf32> to vector<16x32xbf16>
    %c0_10 = arith.constant 0 : index
    %c0_11 = arith.constant 0 : index
    %31 = vector.load %arg11[%c0_10, %c0_11] : memref<32x96xbf16, #tpu.memory_space<vmem>>, vector<32x96xbf16>
    %cst_12 = arith.constant dense<0.000000e+00> : vector<16x96xf32>
    %32 = tpu.matmul %30, %31, %cst_12 {dimension_numbers = #tpu.dot_dimension_numbers<[1], [0], [0], [1], [0, 0, 1, 1], [], []>} : vector<16x32xbf16>, vector<32x96xbf16>, vector<16x96xf32> -> vector<16x96xf32>
    %33 = vector.extract_strided_slice %32 {offsets = [0, 0], sizes = [16, 32], strides = [1, 1]} : vector<16x96xf32> to vector<16x32xf32>
    %34 = vector.extract_strided_slice %32 {offsets = [0, 32], sizes = [16, 32], strides = [1, 1]} : vector<16x96xf32> to vector<16x32xf32>
    %35 = vector.extract_strided_slice %32 {offsets = [0, 64], sizes = [16, 32], strides = [1, 1]} : vector<16x96xf32> to vector<16x32xf32>
    %36 = arith.truncf %35 : vector<16x32xf32> to vector<16x32xbf16>
    %c0_13 = arith.constant 0 : index
    %c0_14 = arith.constant 0 : index
    %c0_15 = arith.constant 0 : index
    %37 = vector.load %arg14[%c0_13, %c0_14, %c0_15] : memref<1x16x32xbf16, #tpu.memory_space<vmem>>, vector<1x16x32xbf16>
    %38 = vector.shape_cast %37 : vector<1x16x32xbf16> to vector<16x32xbf16>
    %39 = vector.shape_cast %36 : vector<16x32xbf16> to vector<1x16x32xbf16>
    tpu.vector_store %arg14[%c0_13, %c0_14, %c0_15], %39 {strides = array<i32>} : memref<1x16x32xbf16, #tpu.memory_space<vmem>>, vector<1x16x32xbf16>,
    %c0_16 = arith.constant 0 : index
    %c0_17 = arith.constant 0 : index
    %40 = vector.load %arg5[%c0_16, %c0_17] : memref<32x4xf32, #tpu.memory_space<vmem>>, vector<32x4xf32>
    %c0_18 = arith.constant 0 : index
    %c0_19 = arith.constant 0 : index
    %41 = vector.load %arg6[%c0_18, %c0_19] : memref<4x32xf32, #tpu.memory_space<vmem>>, vector<4x32xf32>
    %c0_20 = arith.constant 0 : index
    %c0_21 = arith.constant 0 : index
    %42 = vector.load %arg7[%c0_20, %c0_21] : memref<1x32xf32, #tpu.memory_space<vmem>>, vector<1x32xf32>
    %43 = vector.shape_cast %42 : vector<1x32xf32> to vector<32xf32>
    %c0_22 = arith.constant 0 : index
    %c0_23 = arith.constant 0 : index
    %44 = vector.load %arg8[%c0_22, %c0_23] : memref<1x32xf32, #tpu.memory_space<vmem>>, vector<1x32xf32>
    %45 = vector.shape_cast %44 : vector<1x32xf32> to vector<32xf32>
    %cst_24 = arith.constant dense<0.000000e+00> : vector<16x4xf32>
    %46 = tpu.matmul %33, %40, %cst_24 {dimension_numbers = #tpu.dot_dimension_numbers<[1], [0], [0], [1], [0, 0, 1, 1], [], []>} : vector<16x32xf32>, vector<32x4xf32>, vector<16x4xf32> -> vector<16x4xf32>
    %cst_25 = arith.constant dense<0.000000e+00> : vector<16x32xf32>
    %47 = tpu.matmul %46, %41, %cst_25 {dimension_numbers = #tpu.dot_dimension_numbers<[1], [0], [0], [1], [0, 0, 1, 1], [], []>} : vector<16x4xf32>, vector<4x32xf32>, vector<16x32xf32> -> vector<16x32xf32>
    %48 = arith.mulf %33, %33 : vector<16x32xf32>
    %cst_26 = arith.constant dense<0.000000e+00> : vector<16x4xf32>
    %49 = tpu.matmul %48, %40, %cst_26 {dimension_numbers = #tpu.dot_dimension_numbers<[1], [0], [0], [1], [0, 0, 1, 1], [], []>} : vector<16x32xf32>, vector<32x4xf32>, vector<16x4xf32> -> vector<16x4xf32>
    %cst_27 = arith.constant dense<0.000000e+00> : vector<16x32xf32>
    %50 = tpu.matmul %49, %41, %cst_27 {dimension_numbers = #tpu.dot_dimension_numbers<[1], [0], [0], [1], [0, 0, 1, 1], [], []>} : vector<16x4xf32>, vector<4x32xf32>, vector<16x32xf32> -> vector<16x32xf32>
    %51 = arith.mulf %47, %47 : vector<16x32xf32>
    %52 = arith.subf %50, %51 : vector<16x32xf32>
    %53 = arith.subf %33, %47 : vector<16x32xf32>
    %cst_28 = arith.constant 9.99999997E-7 : f32
    %54 = vector.broadcast %cst_28 : f32 to vector<16x32xf32>
    %55 = arith.addf %52, %54 : vector<16x32xf32>
    %56 = math.rsqrt %55 : vector<16x32xf32>
    %57 = arith.mulf %53, %56 : vector<16x32xf32>
    %58 = vector.shape_cast %43 : vector<32xf32> to vector<1x32xf32>
    %59 = vector.broadcast %58 : vector<1x32xf32> to vector<16x32xf32>
    %60 = arith.mulf %57, %59 : vector<16x32xf32>
    %61 = vector.shape_cast %45 : vector<32xf32> to vector<1x32xf32>
    %62 = vector.broadcast %61 : vector<1x32xf32> to vector<16x32xf32>
    %63 = arith.addf %60, %62 : vector<16x32xf32>
    %64 = arith.truncf %63 : vector<16x32xf32> to vector<16x32xbf16>
    %c0_29 = arith.constant 0 : index
    %c0_30 = arith.constant 0 : index
    %c0_31 = arith.constant 0 : index
    %65 = vector.load %arg12[%c0_29, %c0_30, %c0_31] : memref<1x16x32xbf16, #tpu.memory_space<vmem>>, vector<1x16x32xbf16>
    %66 = vector.shape_cast %65 : vector<1x16x32xbf16> to vector<16x32xbf16>
    %67 = vector.shape_cast %64 : vector<16x32xbf16> to vector<1x16x32xbf16>
    tpu.vector_store %arg12[%c0_29, %c0_30, %c0_31], %67 {strides = array<i32>} : memref<1x16x32xbf16, #tpu.memory_space<vmem>>, vector<1x16x32xbf16>,
    %c0_32 = arith.constant 0 : index
    %c0_33 = arith.constant 0 : index
    %68 = vector.load %arg9[%c0_32, %c0_33] : memref<1x32xf32, #tpu.memory_space<vmem>>, vector<1x32xf32>
    %69 = vector.shape_cast %68 : vector<1x32xf32> to vector<32xf32>
    %c0_34 = arith.constant 0 : index
    %c0_35 = arith.constant 0 : index
    %70 = vector.load %arg10[%c0_34, %c0_35] : memref<1x32xf32, #tpu.memory_space<vmem>>, vector<1x32xf32>
    %71 = vector.shape_cast %70 : vector<1x32xf32> to vector<32xf32>
    %cst_36 = arith.constant dense<0.000000e+00> : vector<16x4xf32>
    %72 = tpu.matmul %34, %40, %cst_36 {dimension_numbers = #tpu.dot_dimension_numbers<[1], [0], [0], [1], [0, 0, 1, 1], [], []>} : vector<16x32xf32>, vector<32x4xf32>, vector<16x4xf32> -> vector<16x4xf32>
    %cst_37 = arith.constant dense<0.000000e+00> : vector<16x32xf32>
    %73 = tpu.matmul %72, %41, %cst_37 {dimension_numbers = #tpu.dot_dimension_numbers<[1], [0], [0], [1], [0, 0, 1, 1], [], []>} : vector<16x4xf32>, vector<4x32xf32>, vector<16x32xf32> -> vector<16x32xf32>
    %74 = arith.mulf %34, %34 : vector<16x32xf32>
    %cst_38 = arith.constant dense<0.000000e+00> : vector<16x4xf32>
    %75 = tpu.matmul %74, %40, %cst_38 {dimension_numbers = #tpu.dot_dimension_numbers<[1], [0], [0], [1], [0, 0, 1, 1], [], []>} : vector<16x32xf32>, vector<32x4xf32>, vector<16x4xf32> -> vector<16x4xf32>
    %cst_39 = arith.constant dense<0.000000e+00> : vector<16x32xf32>
    %76 = tpu.matmul %75, %41, %cst_39 {dimension_numbers = #tpu.dot_dimension_numbers<[1], [0], [0], [1], [0, 0, 1, 1], [], []>} : vector<16x4xf32>, vector<4x32xf32>, vector<16x32xf32> -> vector<16x32xf32>
    %77 = arith.mulf %73, %73 : vector<16x32xf32>
    %78 = arith.subf %76, %77 : vector<16x32xf32>
    %79 = arith.subf %34, %73 : vector<16x32xf32>
    %cst_40 = arith.constant 9.99999997E-7 : f32
    %80 = vector.broadcast %cst_40 : f32 to vector<16x32xf32>
    %81 = arith.addf %78, %80 : vector<16x32xf32>
    %82 = math.rsqrt %81 : vector<16x32xf32>
    %83 = arith.mulf %79, %82 : vector<16x32xf32>
    %84 = vector.shape_cast %69 : vector<32xf32> to vector<1x32xf32>
    %85 = vector.broadcast %84 : vector<1x32xf32> to vector<16x32xf32>
    %86 = arith.mulf %83, %85 : vector<16x32xf32>
    %87 = vector.shape_cast %71 : vector<32xf32> to vector<1x32xf32>
    %88 = vector.broadcast %87 : vector<1x32xf32> to vector<16x32xf32>
    %89 = arith.addf %86, %88 : vector<16x32xf32>
    %90 = arith.truncf %89 : vector<16x32xf32> to vector<16x32xbf16>
    %c0_41 = arith.constant 0 : index
    %c0_42 = arith.constant 0 : index
    %c0_43 = arith.constant 0 : index
    %91 = vector.load %arg13[%c0_41, %c0_42, %c0_43] : memref<1x16x32xbf16, #tpu.memory_space<vmem>>, vector<1x16x32xbf16>
    %92 = vector.shape_cast %91 : vector<1x16x32xbf16> to vector<16x32xbf16>
    %93 = vector.shape_cast %90 : vector<16x32xbf16> to vector<1x16x32xbf16>
    tpu.vector_store %arg13[%c0_41, %c0_42, %c0_43], %93 {strides = array<i32>} : memref<1x16x32xbf16, #tpu.memory_space<vmem>>, vector<1x16x32xbf16>,
    return
  }
  func.func @transform_0(%arg0: i32, %arg1: i32) -> (i32, i32, i32) {
    %c0_i32 = arith.constant 0 : i32
    %c0_i32_0 = arith.constant 0 : i32
    return %arg0, %arg1, %c0_i32 : i32, i32, i32
  }
  func.func @transform_1(%arg0: i32, %arg1: i32) -> (i32, i32) {
    %c0_i32 = arith.constant 0 : i32
    %c0_i32_0 = arith.constant 0 : i32
    %c0_i32_1 = arith.constant 0 : i32
    return %c0_i32, %c0_i32_0 : i32, i32
  }
  func.func @transform_2(%arg0: i32, %arg1: i32) -> (i32, i32) {
    %c0_i32 = arith.constant 0 : i32
    %c0_i32_0 = arith.constant 0 : i32
    %c0_i32_1 = arith.constant 0 : i32
    return %c0_i32, %c0_i32_0 : i32, i32
  }
  func.func @transform_3(%arg0: i32, %arg1: i32) -> (i32, i32) {
    %c0_i32 = arith.constant 0 : i32
    %c0_i32_0 = arith.constant 0 : i32
    %c0_i32_1 = arith.constant 0 : i32
    return %c0_i32, %c0_i32_0 : i32, i32
  }
  func.func @transform_4(%arg0: i32, %arg1: i32) -> (i32, i32) {
    %c0_i32 = arith.constant 0 : i32
    %c0_i32_0 = arith.constant 0 : i32
    %c0_i32_1 = arith.constant 0 : i32
    return %c0_i32, %c0_i32_0 : i32, i32
  }
  func.func @transform_5(%arg0: i32, %arg1: i32) -> (i32, i32) {
    %c0_i32 = arith.constant 0 : i32
    %c0_i32_0 = arith.constant 0 : i32
    %c0_i32_1 = arith.constant 0 : i32
    return %c0_i32, %c0_i32_0 : i32, i32
  }
  func.func @transform_6(%arg0: i32, %arg1: i32) -> (i32, i32) {
    %c0_i32 = arith.constant 0 : i32
    %c0_i32_0 = arith.constant 0 : i32
    %c0_i32_1 = arith.constant 0 : i32
    return %c0_i32, %c0_i32_0 : i32, i32
  }
  func.func @transform_7(%arg0: i32, %arg1: i32) -> (i32, i32) {
    %c0_i32 = arith.constant 0 : i32
    %c0_i32_0 = arith.constant 0 : i32
    %c0_i32_1 = arith.constant 0 : i32
    return %c0_i32, %c0_i32_0 : i32, i32
  }
  func.func @transform_8(%arg0: i32, %arg1: i32) -> (i32, i32) {
    %c0_i32 = arith.constant 0 : i32
    %c0_i32_0 = arith.constant 0 : i32
    %c0_i32_1 = arith.constant 0 : i32
    return %c0_i32, %c0_i32_0 : i32, i32
  }
  func.func @transform_9(%arg0: i32, %arg1: i32) -> (i32, i32) {
    %c0_i32 = arith.constant 0 : i32
    %c0_i32_0 = arith.constant 0 : i32
    %c0_i32_1 = arith.constant 0 : i32
    return %c0_i32, %c0_i32_0 : i32, i32
  }
  func.func @transform_10(%arg0: i32, %arg1: i32) -> (i32, i32, i32) {
    %c0_i32 = arith.constant 0 : i32
    %c0_i32_0 = arith.constant 0 : i32
    return %arg0, %arg1, %c0_i32 : i32, i32, i32
  }
  func.func @transform_11(%arg0: i32, %arg1: i32) -> (i32, i32, i32) {
    %c0_i32 = arith.constant 0 : i32
    %c0_i32_0 = arith.constant 0 : i32
    return %arg0, %arg1, %c0_i32 : i32, i32, i32
  }
  func.func @transform_12(%arg0: i32, %arg1: i32) -> (i32, i32, i32) {
    %c0_i32 = arith.constant 0 : i32
    %c0_i32_0 = arith.constant 0 : i32
    return %arg0, %arg1, %c0_i32 : i32, i32, i32
  }
}

module attributes {stable_mosaic.version = 11 : i64} {
  func.func @_qkv_kernel(%arg0: i32, %arg1: i32, %arg2: memref<1x16x32xf32, #tpu.memory_space<vmem>>, %arg3: memref<1x32xf32, #tpu.memory_space<vmem>>, %arg4: memref<1x32xf32, #tpu.memory_space<vmem>>, %arg5: memref<32x4xf32, #tpu.memory_space<vmem>>, %arg6: memref<4x32xf32, #tpu.memory_space<vmem>>, %arg7: memref<1x32xf32, #tpu.memory_space<vmem>>, %arg8: memref<1x32xf32, #tpu.memory_space<vmem>>, %arg9: memref<1x32xf32, #tpu.memory_space<vmem>>, %arg10: memref<1x32xf32, #tpu.memory_space<vmem>>, %arg11: memref<32x96xbf16, #tpu.memory_space<vmem>>, %arg12: memref<1x16x32xbf16, #tpu.memory_space<vmem>>, %arg13: memref<1x16x32xbf16, #tpu.memory_space<vmem>>, %arg14: memref<1x16x32xbf16, #tpu.memory_space<vmem>>) attributes {dimension_semantics = [#tpu.dimension_semantics<parallel>, #tpu.dimension_semantics<parallel>], iteration_bounds = array<i64: 2, 2>, scalar_prefetch = 0 : i64, scratch_operands = 0 : i64, tpu.core_type = #tpu.core_type<tc>, window_params = [{transform_indices = @transform_0, window_bounds = array<i64: 1, 16, 32>}, {pipeline_mode = #tpu.pipeline_mode<synchronous>, transform_indices = @transform_1, window_bounds = array<i64: 1, 32>}, {pipeline_mode = #tpu.pipeline_mode<synchronous>, transform_indices = @transform_2, window_bounds = array<i64: 1, 32>}, {pipeline_mode = #tpu.pipeline_mode<synchronous>, transform_indices = @transform_3, window_bounds = array<i64: 32, 4>}, {pipeline_mode = #tpu.pipeline_mode<synchronous>, transform_indices = @transform_4, window_bounds = array<i64: 4, 32>}, {pipeline_mode = #tpu.pipeline_mode<synchronous>, transform_indices = @transform_5, window_bounds = array<i64: 1, 32>}, {pipeline_mode = #tpu.pipeline_mode<synchronous>, transform_indices = @transform_6, window_bounds = array<i64: 1, 32>}, {pipeline_mode = #tpu.pipeline_mode<synchronous>, transform_indices = @transform_7, window_bounds = array<i64: 1, 32>}, {pipeline_mode = #tpu.pipeline_mode<synchronous>, transform_indices = @transform_8, window_bounds = array<i64: 1, 32>}, {pipeline_mode = #tpu.pipeline_mode<synchronous>, transform_indices = @transform_9, window_bounds = array<i64: 32, 96>}, {transform_indices = @transform_10, window_bounds = array<i64: 1, 16, 32>}, {transform_indices = @transform_11, window_bounds = array<i64: 1, 16, 32>}, {transform_indices = @transform_12, window_bounds = array<i64: 1, 16, 32>}]} {
    %c0 = arith.constant 0 : index
    %c0_0 = arith.constant 0 : index
    %c0_1 = arith.constant 0 : index
    %0 = vector.load %arg2[%c0, %c0_0, %c0_1] : memref<1x16x32xf32, #tpu.memory_space<vmem>>, vector<1x16x32xf32>
    %1 = vector.shape_cast %0 : vector<1x16x32xf32> to vector<16x32xf32>
    %c0_2 = arith.constant 0 : index
    %c0_3 = arith.constant 0 : index
    %2 = vector.load %arg3[%c0_2, %c0_3] : memref<1x32xf32, #tpu.memory_space<vmem>>, vector<1x32xf32>
    %3 = vector.shape_cast %2 : vector<1x32xf32> to vector<32xf32>
    %c0_4 = arith.constant 0 : index
    %c0_5 = arith.constant 0 : index
    %4 = vector.load %arg4[%c0_4, %c0_5] : memref<1x32xf32, #tpu.memory_space<vmem>>, vector<1x32xf32>
    %5 = vector.shape_cast %4 : vector<1x32xf32> to vector<32xf32>
    %cst = arith.constant dense<0.000000e+00> : vector<16xf32>
    %6 = vector.multi_reduction <add>, %1, %cst [1] : vector<16x32xf32> to vector<16xf32>
    %7 = vector.shape_cast %6 : vector<16xf32> to vector<16x1xf32>
    %cst_6 = arith.constant 3.200000e+01 : f32
    %8 = vector.broadcast %cst_6 : f32 to vector<16x1xf32>
    %9 = arith.divf %7, %8 : vector<16x1xf32>
    %10 = vector.broadcast %9 : vector<16x1xf32> to vector<16x32xf32>
    %11 = arith.subf %1, %10 : vector<16x32xf32>
    %12 = arith.mulf %11, %11 : vector<16x32xf32>
    %cst_7 = arith.constant dense<0.000000e+00> : vector<16xf32>
    %13 = vector.multi_reduction <add>, %12, %cst_7 [1] : vector<16x32xf32> to vector<16xf32>
    %14 = vector.shape_cast %13 : vector<16xf32> to vector<16x1xf32>
    %cst_8 = arith.constant 3.200000e+01 : f32
    %15 = vector.broadcast %cst_8 : f32 to vector<16x1xf32>
    %16 = arith.divf %14, %15 : vector<16x1xf32>
    %17 = vector.broadcast %9 : vector<16x1xf32> to vector<16x32xf32>
    %18 = arith.subf %1, %17 : vector<16x32xf32>
    %cst_9 = arith.constant 9.99999997E-7 : f32
    %19 = vector.broadcast %cst_9 : f32 to vector<16x1xf32>
    %20 = arith.addf %16, %19 : vector<16x1xf32>
    %21 = math.rsqrt %20 : vector<16x1xf32>
    %22 = vector.broadcast %21 : vector<16x1xf32> to vector<16x32xf32>
    %23 = arith.mulf %18, %22 : vector<16x32xf32>
    %24 = vector.shape_cast %3 : vector<32xf32> to vector<1x32xf32>
    %25 = vector.broadcast %24 : vector<1x32xf32> to vector<16x32xf32>
    %26 = arith.mulf %23, %25 : vector<16x32xf32>
    %27 = vector.shape_cast %5 : vector<32xf32> to vector<1x32xf32>
    %28 = vector.broadcast %27 : vector<1x32xf32> to vector<16x32xf32>
    %29 = arith.addf %26, %28 : vector<16x32xf32>
    %30 = arith.truncf %29 : vector<16x32xf32> to vector<16x32xbf16>
    %c0_10 = arith.constant 0 : index
    %c0_11 = arith.constant 0 : index
    %31 = vector.load %arg11[%c0_10, %c0_11] : memref<32x96xbf16, #tpu.memory_space<vmem>>, vector<32x96xbf16>
    %cst_12 = arith.constant dense<0.000000e+00> : vector<16x96xf32>
    %32 = tpu.matmul %30, %31, %cst_12 {dimension_numbers = #tpu.dot_dimension_numbers<[1], [0], [0], [1], [0, 0, 1, 1], [], []>} : vector<16x32xbf16>, vector<32x96xbf16>, vector<16x96xf32> -> vector<16x96xf32>
    %33 = vector.extract_strided_slice %32 {offsets = [0, 0], sizes = [16, 32], strides = [1, 1]} : vector<16x96xf32> to vector<16x32xf32>
    %34 = vector.extract_strided_slice %32 {offsets = [0, 32], sizes = [16, 32], strides = [1, 1]} : vector<16x96xf32> to vector<16x32xf32>
    %35 = vector.extract_strided_slice %32 {offsets = [0, 64], sizes = [16, 32], strides = [1, 1]} : vector<16x96xf32> to vector<16x32xf32>
    %36 = arith.truncf %35 : vector<16x32xf32> to vector<16x32xbf16>
    %c0_13 = arith.constant 0 : index
    %c0_14 = arith.constant 0 : index
    %c0_15 = arith.constant 0 : index
    %37 = vector.load %arg14[%c0_13, %c0_14, %c0_15] : memref<1x16x32xbf16, #tpu.memory_space<vmem>>, vector<1x16x32xbf16>
    %38 = vector.shape_cast %37 : vector<1x16x32xbf16> to vector<16x32xbf16>
    %39 = vector.shape_cast %36 : vector<16x32xbf16> to vector<1x16x32xbf16>
    tpu.vector_store %arg14[%c0_13, %c0_14, %c0_15], %39 {strides = array<i32>} : memref<1x16x32xbf16, #tpu.memory_space<vmem>>, vector<1x16x32xbf16>,
    %c0_16 = arith.constant 0 : index
    %c0_17 = arith.constant 0 : index
    %40 = vector.load %arg5[%c0_16, %c0_17] : memref<32x4xf32, #tpu.memory_space<vmem>>, vector<32x4xf32>
    %c0_18 = arith.constant 0 : index
    %c0_19 = arith.constant 0 : index
    %41 = vector.load %arg6[%c0_18, %c0_19] : memref<4x32xf32, #tpu.memory_space<vmem>>, vector<4x32xf32>
    %c0_20 = arith.constant 0 : index
    %c0_21 = arith.constant 0 : index
    %42 = vector.load %arg7[%c0_20, %c0_21] : memref<1x32xf32, #tpu.memory_space<vmem>>, vector<1x32xf32>
    %43 = vector.shape_cast %42 : vector<1x32xf32> to vector<32xf32>
    %c0_22 = arith.constant 0 : index
    %c0_23 = arith.constant 0 : index
    %44 = vector.load %arg8[%c0_22, %c0_23] : memref<1x32xf32, #tpu.memory_space<vmem>>, vector<1x32xf32>
    %45 = vector.shape_cast %44 : vector<1x32xf32> to vector<32xf32>
    %cst_24 = arith.constant dense<0.000000e+00> : vector<16x4xf32>
    %46 = tpu.matmul %33, %40, %cst_24 {dimension_numbers = #tpu.dot_dimension_numbers<[1], [0], [0], [1], [0, 0, 1, 1], [], []>} : vector<16x32xf32>, vector<32x4xf32>, vector<16x4xf32> -> vector<16x4xf32>
    %cst_25 = arith.constant dense<0.000000e+00> : vector<16x32xf32>
    %47 = tpu.matmul %46, %41, %cst_25 {dimension_numbers = #tpu.dot_dimension_numbers<[1], [0], [0], [1], [0, 0, 1, 1], [], []>} : vector<16x4xf32>, vector<4x32xf32>, vector<16x32xf32> -> vector<16x32xf32>
    %48 = arith.mulf %33, %33 : vector<16x32xf32>
    %cst_26 = arith.constant dense<0.000000e+00> : vector<16x4xf32>
    %49 = tpu.matmul %48, %40, %cst_26 {dimension_numbers = #tpu.dot_dimension_numbers<[1], [0], [0], [1], [0, 0, 1, 1], [], []>} : vector<16x32xf32>, vector<32x4xf32>, vector<16x4xf32> -> vector<16x4xf32>
    %cst_27 = arith.constant dense<0.000000e+00> : vector<16x32xf32>
    %50 = tpu.matmul %49, %41, %cst_27 {dimension_numbers = #tpu.dot_dimension_numbers<[1], [0], [0], [1], [0, 0, 1, 1], [], []>} : vector<16x4xf32>, vector<4x32xf32>, vector<16x32xf32> -> vector<16x32xf32>
    %51 = arith.mulf %47, %47 : vector<16x32xf32>
    %52 = arith.subf %50, %51 : vector<16x32xf32>
    %53 = arith.subf %33, %47 : vector<16x32xf32>
    %cst_28 = arith.constant 9.99999997E-7 : f32
    %54 = vector.broadcast %cst_28 : f32 to vector<16x32xf32>
    %55 = arith.addf %52, %54 : vector<16x32xf32>
    %56 = math.rsqrt %55 : vector<16x32xf32>
    %57 = arith.mulf %53, %56 : vector<16x32xf32>
    %58 = vector.shape_cast %43 : vector<32xf32> to vector<1x32xf32>
    %59 = vector.broadcast %58 : vector<1x32xf32> to vector<16x32xf32>
    %60 = arith.mulf %57, %59 : vector<16x32xf32>
    %61 = vector.shape_cast %45 : vector<32xf32> to vector<1x32xf32>
    %62 = vector.broadcast %61 : vector<1x32xf32> to vector<16x32xf32>
    %63 = arith.addf %60, %62 : vector<16x32xf32>
    %64 = arith.truncf %63 : vector<16x32xf32> to vector<16x32xbf16>
    %c0_29 = arith.constant 0 : index
    %c0_30 = arith.constant 0 : index
    %c0_31 = arith.constant 0 : index
    %65 = vector.load %arg12[%c0_29, %c0_30, %c0_31] : memref<1x16x32xbf16, #tpu.memory_space<vmem>>, vector<1x16x32xbf16>
    %66 = vector.shape_cast %65 : vector<1x16x32xbf16> to vector<16x32xbf16>
    %67 = vector.shape_cast %64 : vector<16x32xbf16> to vector<1x16x32xbf16>
    tpu.vector_store %arg12[%c0_29, %c0_30, %c0_31], %67 {strides = array<i32>} : memref<1x16x32xbf16, #tpu.memory_space<vmem>>, vector<1x16x32xbf16>,
    %c0_32 = arith.constant 0 : index
    %c0_33 = arith.constant 0 : index
    %68 = vector.load %arg9[%c0_32, %c0_33] : memref<1x32xf32, #tpu.memory_space<vmem>>, vector<1x32xf32>
    %69 = vector.shape_cast %68 : vector<1x32xf32> to vector<32xf32>
    %c0_34 = arith.constant 0 : index
    %c0_35 = arith.constant 0 : index
    %70 = vector.load %arg10[%c0_34, %c0_35] : memref<1x32xf32, #tpu.memory_space<vmem>>, vector<1x32xf32>
    %71 = vector.shape_cast %70 : vector<1x32xf32> to vector<32xf32>
    %cst_36 = arith.constant dense<0.000000e+00> : vector<16x4xf32>
    %72 = tpu.matmul %34, %40, %cst_36 {dimension_numbers = #tpu.dot_dimension_numbers<[1], [0], [0], [1], [0, 0, 1, 1], [], []>} : vector<16x32xf32>, vector<32x4xf32>, vector<16x4xf32> -> vector<16x4xf32>
    %cst_37 = arith.constant dense<0.000000e+00> : vector<16x32xf32>
    %73 = tpu.matmul %72, %41, %cst_37 {dimension_numbers = #tpu.dot_dimension_numbers<[1], [0], [0], [1], [0, 0, 1, 1], [], []>} : vector<16x4xf32>, vector<4x32xf32>, vector<16x32xf32> -> vector<16x32xf32>
    %74 = arith.mulf %34, %34 : vector<16x32xf32>
    %cst_38 = arith.constant dense<0.000000e+00> : vector<16x4xf32>
    %75 = tpu.matmul %74, %40, %cst_38 {dimension_numbers = #tpu.dot_dimension_numbers<[1], [0], [0], [1], [0, 0, 1, 1], [], []>} : vector<16x32xf32>, vector<32x4xf32>, vector<16x4xf32> -> vector<16x4xf32>
    %cst_39 = arith.constant dense<0.000000e+00> : vector<16x32xf32>
    %76 = tpu.matmul %75, %41, %cst_39 {dimension_numbers = #tpu.dot_dimension_numbers<[1], [0], [0], [1], [0, 0, 1, 1], [], []>} : vector<16x4xf32>, vector<4x32xf32>, vector<16x32xf32> -> vector<16x32xf32>
    %77 = arith.mulf %73, %73 : vector<16x32xf32>
    %78 = arith.subf %76, %77 : vector<16x32xf32>
    %79 = arith.subf %34, %73 : vector<16x32xf32>
    %cst_40 = arith.constant 9.99999997E-7 : f32
    %80 = vector.broadcast %cst_40 : f32 to vector<16x32xf32>
    %81 = arith.addf %78, %80 : vector<16x32xf32>
    %82 = math.rsqrt %81 : vector<16x32xf32>
    %83 = arith.mulf %79, %82 : vector<16x32xf32>
    %84 = vector.shape_cast %69 : vector<32xf32> to vector<1x32xf32>
    %85 = vector.broadcast %84 : vector<1x32xf32> to vector<16x32xf32>
    %86 = arith.mulf %83, %85 : vector<16x32xf32>
    %87 = vector.shape_cast %71 : vector<32xf32> to vector<1x32xf32>
    %88 = vector.broadcast %87 : vector<1x32xf32> to vector<16x32xf32>
    %89 = arith.addf %86, %88 : vector<16x32xf32>
    %90 = arith.truncf %89 : vector<16x32xf32> to vector<16x32xbf16>
    %c0_41 = arith.constant 0 : index
    %c0_42 = arith.constant 0 : index
    %c0_43 = arith.constant 0 : index
    %91 = vector.load %arg13[%c0_41, %c0_42, %c0_43] : memref<1x16x32xbf16, #tpu.memory_space<vmem>>, vector<1x16x32xbf16>
    %92 = vector.shape_cast %91 : vector<1x16x32xbf16> to vector<16x32xbf16>
    %93 = vector.shape_cast %90 : vector<16x32xbf16> to vector<1x16x32xbf16>
    tpu.vector_store %arg13[%c0_41, %c0_42, %c0_43], %93 {strides = array<i32>} : memref<1x16x32xbf16, #tpu.memory_space<vmem>>, vector<1x16x32xbf16>,
    return
  }
  func.func @transform_0(%arg0: i32, %arg1: i32) -> (i32, i32, i32) {
    %c0_i32 = arith.constant 0 : i32
    %c0_i32_0 = arith.constant 0 : i32
    return %arg0, %arg1, %c0_i32 : i32, i32, i32
  }
  func.func @transform_1(%arg0: i32, %arg1: i32) -> (i32, i32) {
    %c0_i32 = arith.constant 0 : i32
    %c0_i32_0 = arith.constant 0 : i32
    %c0_i32_1 = arith.constant 0 : i32
    return %c0_i32, %c0_i32_0 : i32, i32
  }
  func.func @transform_2(%arg0: i32, %arg1: i32) -> (i32, i32) {
    %c0_i32 = arith.constant 0 : i32
    %c0_i32_0 = arith.constant 0 : i32
    %c0_i32_1 = arith.constant 0 : i32
    return %c0_i32, %c0_i32_0 : i32, i32
  }
  func.func @transform_3(%arg0: i32, %arg1: i32) -> (i32, i32) {
    %c0_i32 = arith.constant 0 : i32
    %c0_i32_0 = arith.constant 0 : i32
    %c0_i32_1 = arith.constant 0 : i32
    return %c0_i32, %c0_i32_0 : i32, i32
  }
  func.func @transform_4(%arg0: i32, %arg1: i32) -> (i32, i32) {
    %c0_i32 = arith.constant 0 : i32
    %c0_i32_0 = arith.constant 0 : i32
    %c0_i32_1 = arith.constant 0 : i32
    return %c0_i32, %c0_i32_0 : i32, i32
  }
  func.func @transform_5(%arg0: i32, %arg1: i32) -> (i32, i32) {
    %c0_i32 = arith.constant 0 : i32
    %c0_i32_0 = arith.constant 0 : i32
    %c0_i32_1 = arith.constant 0 : i32
    return %c0_i32, %c0_i32_0 : i32, i32
  }
  func.func @transform_6(%arg0: i32, %arg1: i32) -> (i32, i32) {
    %c0_i32 = arith.constant 0 : i32
    %c0_i32_0 = arith.constant 0 : i32
    %c0_i32_1 = arith.constant 0 : i32
    return %c0_i32, %c0_i32_0 : i32, i32
  }
  func.func @transform_7(%arg0: i32, %arg1: i32) -> (i32, i32) {
    %c0_i32 = arith.constant 0 : i32
    %c0_i32_0 = arith.constant 0 : i32
    %c0_i32_1 = arith.constant 0 : i32
    return %c0_i32, %c0_i32_0 : i32, i32
  }
  func.func @transform_8(%arg0: i32, %arg1: i32) -> (i32, i32) {
    %c0_i32 = arith.constant 0 : i32
    %c0_i32_0 = arith.constant 0 : i32
    %c0_i32_1 = arith.constant 0 : i32
    return %c0_i32, %c0_i32_0 : i32, i32
  }
  func.func @transform_9(%arg0: i32, %arg1: i32) -> (i32, i32) {
    %c0_i32 = arith.constant 0 : i32
    %c0_i32_0 = arith.constant 0 : i32
    %c0_i32_1 = arith.constant 0 : i32
    return %c0_i32, %c0_i32_0 : i32, i32
  }
  func.func @transform_10(%arg0: i32, %arg1: i32) -> (i32, i32, i32) {
    %c0_i32 = arith.constant 0 : i32
    %c0_i32_0 = arith.constant 0 : i32
    return %arg0, %arg1, %c0_i32 : i32, i32, i32
  }
  func.func @transform_11(%arg0: i32, %arg1: i32) -> (i32, i32, i32) {
    %c0_i32 = arith.constant 0 : i32
    %c0_i32_0 = arith.constant 0 : i32
    return %arg0, %arg1, %c0_i32 : i32, i32, i32
  }
  func.func @transform_12(%arg0: i32, %arg1: i32) -> (i32, i32, i32) {
    %c0_i32 = arith.constant 0 : i32
    %c0_i32_0 = arith.constant 0 : i32
    return %arg0, %arg1, %c0_i32 : i32, i32, i32
  }
}

</mosaic_0001>

<bundles_post_ra>
// kernel: tpu_custom_call.1
= control target key start
LH: loop header
LB: loop body
LE: loop exit
PB: predicated region body
PF: predicated region fallthrough
CT: control target
= control target key end

     0   :  { %s1962_s0 = inlined_call_operand.hbm [shape: f32[2,32,32], index: 0, kind: input, shape index: {}]   ;;  %s1963_s1 = inlined_call_operand.vmem [shape: f32[1,32], index: 1, kind: input, shape index: {}]   ;;  %s1964_s2 = inlined_call_operand.vmem [shape: f32[1,32], index: 2, kind: input, shape index: {}]   ;;  %s1965_s3 = inlined_call_operand.vmem [shape: f32[32,4], index: 3, kind: input, shape index: {}]   ;;  %s1966_s4 = inlined_call_operand.vmem [shape: f32[4,32], index: 4, kind: input, shape index: {}]   ;;  %s1967_s5 = inlined_call_operand.vmem [shape: f32[1,32], index: 5, kind: input, shape index: {}]   ;;  %s1968_s6 = inlined_call_operand.vmem [shape: f32[1,32], index: 6, kind: input, shape index: {}]   ;;  %s1969_s7 = inlined_call_operand.vmem [shape: f32[1,32], index: 7, kind: input, shape index: {}]   ;;  %s1970_s8 = inlined_call_operand.vmem [shape: f32[1,32], index: 8, kind: input, shape index: {}]   ;;  %s1971_s9 = inlined_call_operand.vmem [shape: bf16[32,96], index: 9, kind: input, shape index: {}]   ;;  %s1972_s10 = inlined_call_operand.hbm [shape: bf16[2,32,32], index: 10, kind: output, shape index: {0}]   ;;  %s1973_s11 = inlined_call_operand.hbm [shape: bf16[2,32,32], index: 11, kind: output, shape index: {1}]   ;;  %s1974_s12 = inlined_call_operand.hbm [shape: bf16[2,32,32], index: 12, kind: output, shape index: {2}]  }
   0x1   :  { %1993 = sst [smem:[#allocation21_spill]] %s1962_s0 }
   0x2   :  { %1994 = sst [smem:[#allocation22_spill]] %s1963_s1 }
   0x3   :  { %1995 = sst [smem:[#allocation23_spill]] %s1964_s2 }
   0x4   :  { %1996 = sst [smem:[#allocation24_spill]] %s1969_s7 }
   0x5   :  { %1997 = sst [smem:[#allocation25_spill]] %s1972_s10 }
   0x6   :  { %1998 = sst [smem:[#allocation26_spill]] %s1973_s11 }
   0x7   :  { %1999 = sst [smem:[#allocation27_spill]] %s1974_s12 }
   0x8   :  { %18 = vsyncpa [#allocation3], 0 }
   0x9   :  { %20 = vsyncpa [#allocation3 + $0x1], 0 }
   0xa   :  { %21 = vsyncpa [#allocation4], 0 }
   0xb   :  { %23 = vsyncpa [#allocation4 + $0x1], 0 }
   0xc   :  { %24 = vsyncpa [#allocation7], 0 }
   0xd   :  { %26 = vsyncpa [#allocation7 + $0x1], 0  ;;  %s1621_s21 = smov 0   ;;  %s1623_s22 = smov 0  }
   0xe   :  { %s1625_s23 = smov 0   ;;  %s1627_s24 = smov 0  }
   0xf   :  { %s1629_s25 = smov 0   ;;  %s1631_s26 = smov 0  }
  0x10   :  { %s1633_s27 = smov 0   ;;  %s1635_s28 = smov 0  }
  0x11 LB: > { %2000 = sst [smem:[#allocation12_spill]] %s1519_s21  ;;  %s1662_s29 = sadd.s32 4294967295, %s1547_s28   ;;  %s1547_s28 = sphi %s1635_s28, %s32_s28   ;;  %s1543_s27 = sphi %s1633_s27, %s2039_s27   ;;  %s1539_s26 = sphi %s1631_s26, %s2038_s26   ;;  %s1535_s25 = sphi %s1629_s25, %s2037_s25   ;;  %s1531_s24 = sphi %s1627_s24, %s2036_s24   ;;  %s1527_s23 = sphi %s1625_s23, %s2035_s23   ;;  %s1523_s22 = sphi %s1623_s22, %s2034_s22   ;;  %s1519_s21 = sphi %s1621_s21, %s2033_s21  }
  0x12   : > { %2001 = sst [smem:[#allocation13_spill]] %s1527_s23  ;;  %s1984_s30 = sadd.s32 4294967294, %s1547_s28  }
  0x13   : > { %2002 = sst [smem:[#allocation14_spill]] %s1535_s25  ;;  %s41_s13 = sadd.s32 1, %s1539_s26 }
  0x14   : > { %2003 = sst [smem:[#allocation15_spill]] %s1662_s29  ;;  %s44_s14 = sadd.s32 1, %s1543_s27 }
  0x15   : > { %p42_p0 = scmp.ge.s32.totalorder %s41_s13, 2  ;;  %s53_s15 = sadd.s32 1, %s1527_s23 }
  0x16   : > { %p60_p1 = scmp.ne.s32.totalorder %s1527_s23, %s1523_s22  ;;  %p61_p2 = scmp.eq.s32.totalorder %s1547_s28, 0 }
  0x17   : > { %s2041_s13 = smov (%p42_p0, %s41_s13), 0  ;;  %s2043_s14 = smov (!%p42_p0, %s44_s14), %s1543_s27 }
  0x18   : > { %2004 = sst [smem:[#allocation16_spill]] %s2041_s13  ;;  %s49_s16 = ssub.s32 %s1539_s26, %s2041_s13 }
  0x19   : > { %p1676_p3 = por %p61_p2, %p60_p1  ;;  %p46_p4 = scmp.ge.s32.totalorder %s2043_s14, 2 }
  0x1a   : > { %p66_p5 = scmp.ne.s32.totalorder %s1523_s22, %s1519_s21  ;;  %p67_p6 = scmp.eq.s32.totalorder %s1662_s29, 0 }
  0x1b   : > { %p281_p7 = scmp.eq.s32.totalorder %s1662_s29, 3  ;;  %s2045_s14 = smov (%p46_p4, %s2043_s14), 0 }
  0x1c   : > { %2006 = sst [smem:[#allocation17_spill]] %s2045_s14  ;;  %p1686_p8 = por %p67_p6, %p66_p5 }
  0x1d   : > { %p1690_p9 = por %p281_p7, %p60_p1  ;;  %s48_s20 = ssub.s32 %s1543_s27, %s2045_s14 }
  0x1e   : > { %p287_p10 = scmp.eq.s32.totalorder %s1984_s30, 3  ;;  %s50_s13 = sor.u32 %s49_s16, %s48_s20 }
  0x1f   : > { %s2008_s19 = scalar_select %p1690_p9, 1, 0 }
  0x20   : > { %p51_p11 = scmp.eq.s32.totalorder %s50_s13, 0  ;;  %p1698_p12 = por %p287_p10, %p66_p5 }
  0x21   : > { %2009 = sst [smem:[#allocation18_spill]] %s2008_s19  ;;  %p1266_p13 = scmp.lt.s32.totalorder %s1547_s28, 4 }
  0x22   : > { %s2010_s21 = scalar_select %p1698_p12, 1, 0 }
  0x23   : > { %s390_s12 = sand.u32 1, %s1527_s23   ;;  %s1190_s10 = sshll.u32 %s1539_s26, 1 }
  0x24   : > { %2011 = sst [smem:[#allocation19_spill]] %s2010_s21  ;;  %s1189_s29 = sshll.u32 %s390_s12, 4 }
  0x25   : > { %s1705_s11 = scalar_select %p51_p11, %s1527_s23, %s53_s15  }
  0x26   : > { %s1191_s7 = sshll.u32 %s1543_s27, 2  ;;  %s394_s19 = scalar_lea.vmem [#allocation2], %s1189_s29 }
  0x27   : > { %2012 = sst [smem:[#allocation20_spill]] %s1705_s11  ;;  %s404_s14 = sshll.u32 %s394_s19, 4  ;;  %s405_s14 = int_to_ptr.vmem [resolvable:$true] %s404_s14 }
  0x28   : > { %s399_s25 = sadd.s32 %s1191_s7, %s1190_s10  ;;  %p1253_p0 = pnand %p1266_p13, %p1676_p3 }
  0x29   : > { %s1192_s30 = sshll.u32 %s399_s25, 3  ;;  %s2013_s0 = sld [smem:[#allocation21_spill]] }
  0x2a   : > { %s391_s15 = scalar_lea.sflag [#allocation3], %s390_s12  ;;  %s1549_s11 = smov 128  }
  0x2b   : > { %s1550_s23 = smov 8   ;;  %p1193_p1 = scmp.ge.s32.totalorder %s1547_s28, 1 }
  0x2c   : > { %p412_p2 = scmp.lt.s32.totalorder %s1547_s28, 5 }
  0x2e   : > { %p413_p4 = pnand %p1193_p1, %p412_p2 }
  0x2f   : > { %s401_s20 = scalar_lea.hbm %s2013_s0, %s1192_s30  ;;  %s1717_s7 = sand.u32 (!%p413_p4), 1, %s1523_s22  }
  0x30   : > { %s402_s21 = sshll.u32 %s401_s20, 4  ;;  %416 = sbr.rel (%p413_p4) target bundleno = 1107 (0x453), region = 60  ;;  %s403_s21 = int_to_ptr.hbm [resolvable:$true] %s402_s21 }
  0x31   : > { %1255 = dma.hbm_to_vmem [thread:$0]  (!%p1253_p0), %s403_s21, 256, %s405_s14, %s391_s15, %s1549_s11, %s1549_s11, %s1550_s23  }
  0x32   : > { %s1194_s10 = sshll.u32 (!%p413_p4), %s1717_s7, 4  ;;  %s419_s25 = scalar_lea.sflag (!%p413_p4), [#allocation3], %s1717_s7 }
  0x33   : > { %s422_s29 = scalar_lea.vmem (!%p413_p4), [#allocation2], %s1194_s10 }
  0x35   : > { %1506 = dma.done.wait (%p1686_p8), %s419_s25, 256  }
  0x36   : > { %1508 = vsyncadd (%p1686_p8), %s419_s25, 4294967040  ;;  %vm483_vm0 = vcmask 261120   ;;  %v479_v0 = vld [vmem:[%s422_s29] sm:$0xff]  ;;  %v480_v2 = vld [vmem:[%s422_s29 + $0x8] sm:$0xff]  ;;  %v1551_v4 = vmov 32.0   ;;  %s2014_s1 = sld [smem:[#allocation22_spill]] }
  0x37   : > { %v484_v1 = vsel %vm483_vm0, %v479_v0, 0.0  ;;  %v487_v3 = vsel %vm483_vm0, %v480_v2, 0.0  ;;  %1345 = vrcp.f32 %v1551_v4  ;;  %v1242_v21 = vld [vmem:[%s1971_s9 + $0x8] sm:$0xff]  ;;  %v1241_v23 = vld [vmem:[%s1971_s9] sm:$0xff]  ;;  %v1738_v26 = vld [vmem:[%s1965_s3 + $0x18] sm:$0xff]  ;;  %s2015_s2 = sld [smem:[#allocation23_spill]] }
  0x38   : > { %485 = vadd.xlane.f32.xlu0 %v484_v1  ;;  %571 = vmatpush.bf16.msra.mxu0 %v1242_v21  ;;  %v1743_v27 = vld [vmem:[%s1965_s3 + $0x10] sm:$0xff]  ;;  %v1750_v30 = vld [vmem:[%s1965_s3 + $0x8] sm:$0xff]  ;;  %v592_v55 = vld [vmem:[%s1965_s3] sm:$0xff]  ;;  %s1987_s11 = smov 96   ;;  %s1553_s23 = smov 32   ;;  %vm635_vm8 = vcmask 1043456  }
  0x39   : > { %617 = vmatpush.msra.mxu1 %v1738_v26  ;;  %682 = vmatpush.msra.mxu3 %v1738_v26  ;;  %v1341_v60 = vld [vmem:[%s1970_s8] ss:$0 sm:$0xff]  ;;  %s1989_s30 = smov 64   ;;  %vm628_vm9 = vcmask 31744   ;;  %s1812_s18 = sshll.u32 %s1717_s7, 3  ;;  %vm589_vm10 = vcmask 257024  }
  0x3a   : > { %v596_v62 = vld [vmem:[%s1966_s4] sm:$0xf]  ;;  %s1818_s19 = scalar_lea.vmem [#allocation8], %s1812_s18  ;;  %s1838_s10 = scalar_lea.vmem [#allocation5], %s1812_s18 }
  0x3b   : > { %618 = vmatpush.msra.mxu1 %v1743_v27  ;;  %683 = vmatpush.msra.mxu3 %v1743_v27  ;;  %s2016_s25 = sld [smem:[#allocation14_spill]]  ;;  %s1230_s14 = sshll.u32 %s1531_s24, 1 }
  0x3c   : > { %572 = vmatpush.bf16.msra.mxu0 %v1241_v23  ;;  %v1339_v45 = vld [vmem:[%s2014_s1] ss:$0 sm:$0xff]  ;;  %1243 = vmatpush.msk.msra.mxu2 %vm635_vm8, %v596_v62  ;;  %s2017_s21 = sld [smem:[#allocation24_spill]]  ;;  %s985_s16 = sshll.u32 %s1838_s10, 4  ;;  %s986_s16 = int_to_ptr.vmem [resolvable:$true] %s985_s16 }
  0x3d   : > { %v1346_v5 = vpop.eup %1345  ;;  %619 = vmatpush.msra.mxu1 %v1750_v30  ;;  %684 = vmatpush.msra.mxu3 %v1750_v30  ;;  %v1340_v50 = vld [vmem:[%s2015_s2] ss:$0 sm:$0xff]  ;;  %s2019_s12 = sld [smem:[#allocation25_spill]] }
  0x3e   : > { %v491_v6 = vmul.f32 32.0, %v1346_v5  ;;  %vm495_vm1 = vweird.f32 %v1346_v5  ;;  %1214 = vmatpush.msk.msrb.mxu2 %vm635_vm8, %v596_v62 }
  0x3f   : > { %620 = vmatpush.msra.mxu1 %v592_v55  ;;  %685 = vmatpush.msra.mxu3 %v592_v55 }
  0x40   : > { %488 = vadd.xlane.f32.xlu0 %v487_v3  ;;  %v492_v7 = vsub.f32 1.0, %v491_v6  ;;  %1209 = vmatpush.msk.msrb.mxu0 %vm635_vm8, %v596_v62 }
  0x41   : > { %848 = vmatpush.msrb.mxu3 %v1738_v26  ;;  %1219 = vmatpush.msk.msrb.mxu1 %vm635_vm8, %v596_v62  ;;  %s1231_s17 = sshll.u32 %s2016_s25, 2  ;;  %s961_s25 = scalar_lea.sflag [#allocation4], %s1717_s7 }
  0x42   : > { %v493_v8 = vmul.f32 %v1346_v5, %v492_v7  ;;  %s982_s13 = sadd.s32 %s1231_s17, %s1230_s14 }
  0x43   : > { %849 = vmatpush.msrb.mxu3 %v1743_v27  ;;  %s1856_s15 = sshll.u32 %s982_s13, 2 }
  0x44   : > { %v494_v9 = vadd.f32 %v1346_v5, %v493_v8 }
  0x45   : > { %850 = vmatpush.msrb.mxu3 %v1750_v30 }
  0x46   : > { %v496_v10 = vsel %vm495_vm1, %v1346_v5, %v494_v9 }
  0x47   : > { %851 = vmatpush.msrb.mxu3 %v592_v55 }
  0xab   : > { %v486_v11 = vpop.xlane.xlu0 %485 }
  0xac   : > { %v497_v12 = vmul.f32 %v496_v10, %v486_v11 }
  0xae   : > { %v499_v13 = vsub.f32 %v479_v0, %v497_v12 }
  0xb0   : > { %v501_v14 = vmul.f32 %v499_v13, %v499_v13 }
  0xb2   : > { %v503_v15 = vsel %vm483_vm0, %v501_v14, 0.0 }
  0xb3   : > { %504 = vadd.xlane.f32.xlu1 %v503_v15  ;;  %v489_v16 = vpop.xlane.xlu0 %488 }
  0xb4   : > { %v498_v17 = vmul.f32 %v496_v10, %v489_v16 }
  0xb6   : > { %v500_v18 = vsub.f32 %v480_v2, %v498_v17 }
  0xb8   : > { %v502_v19 = vmul.f32 %v500_v18, %v500_v18 }
  0xba   : > { %v506_v20 = vsel %vm483_vm0, %v502_v19, 0.0 }
  0xbb   : > { %507 = vadd.xlane.f32.xlu1 %v506_v20 }
 0x126   : > { %v505_v22 = vpop.xlane.xlu1 %504 }
 0x127   : > { %v509_v24 = vmul.f32 %v505_v22, %v496_v10 }
 0x129   : > { %v511_v25 = vadd.f32 1e-06, %v509_v24 }
 0x12b   : > { %1347 = vrsqrt.f32 %v511_v25  ;;  %vm519_vm3 = vweird.f32 %v511_v25 }
 0x12e   : > { %v508_v28 = vpop.xlane.xlu1 %507 }
 0x12f   : > { %v510_v29 = vmul.f32 %v508_v28, %v496_v10 }
 0x131   : > { %v1348_v31 = vpop.eup %1347  ;;  %v512_v32 = vadd.f32 1e-06, %v510_v29 }
 0x132   : > { %v514_v33 = vmul.f32 %v1348_v31, %v511_v25  ;;  %vm520_vm2 = vweird.f32 %v1348_v31 }
 0x133   : > { %1349 = vrsqrt.f32 %v512_v32  ;;  %vm521_vm4 = vmor %vm519_vm3, %vm520_vm2  ;;  %vm529_vm6 = vweird.f32 %v512_v32 }
 0x134   : > { %v515_v34 = vmul.f32 %v1348_v31, %v514_v33 }
 0x136   : > { %v516_v35 = vmul.f32 0.5, %v515_v34 }
 0x138   : > { %v517_v36 = vsub.f32 1.5, %v516_v35 }
 0x139   : > { %v1350_v37 = vpop.eup %1349 }
 0x13a   : > { %v518_v38 = vmul.f32 %v1348_v31, %v517_v36  ;;  %v524_v39 = vmul.f32 %v1350_v37, %v512_v32  ;;  %vm530_vm5 = vweird.f32 %v1350_v37  ;;  %v1342_v32 = vld [vmem:[%s1967_s5] ss:$0 sm:$0xff] }
 0x13b   : > { %vm531_vm7 = vmor %vm529_vm6, %vm530_vm5  ;;  %v1343_v36 = vld [vmem:[%s1968_s6] ss:$0 sm:$0xff] }
 0x13c   : > { %v525_v40 = vmul.f32 %v1350_v37, %v524_v39  ;;  %v522_v41 = vsel %vm521_vm4, %v1348_v31, %v518_v38 }
 0x13d   : > { %v533_v44 = vmul.f32 %v522_v41, %v499_v13 }
 0x13e   : > { %v526_v42 = vmul.f32 0.5, %v525_v40 }
 0x13f   : > { %v538_v49 = vmul.f32 %v1339_v45, %v533_v44 }
 0x140   : > { %v527_v43 = vsub.f32 1.5, %v526_v42 }
 0x141   : > { %v543_v52 = vadd.f32 %v1340_v50, %v538_v49 }
 0x142   : > { %v528_v46 = vmul.f32 %v1350_v37, %v527_v43 }
 0x144   : > { %v532_v47 = vsel %vm531_vm7, %v1350_v37, %v528_v46 }
 0x145   : > { %v534_v48 = vmul.f32 %v532_v47, %v500_v18 }
 0x147   : > { %v539_v51 = vmul.f32 %v1339_v45, %v534_v48 }
 0x149   : > { %v544_v53 = vadd.f32 %v1340_v50, %v539_v51 }
 0x14b   : > { %v545_v54 = vpack.c.bf16 %v544_v53, %v543_v52 }
 0x14d   : > { %1206 = vmatmul.msk.bf16.vlgmr.msra.gmra.mxu0 %vm483_vm0, %v545_v54 }
 0x14e   : > { %788 = vmatpush.msra.mxu0 %v1738_v26 }
 0x150   : > { %789 = vmatpush.msra.mxu0 %v1743_v27 }
 0x152   : > { %790 = vmatpush.msra.mxu0 %v1750_v30 }
 0x154   : > { %791 = vmatpush.msra.mxu0 %v592_v55 }
 0x1ca   : > { %v1769_v56 = vpop.f32.mrf.mxu0 }
 0x1cb   : > { %768 = vrot.lane.b32.xlu0 %v1769_v56, %s1987_s11  ;;  %1207 = vmatmul.msk.f32.vlgmr.msra.gmra.mxu1 %vm483_vm0, %v1769_v56  ;;  %v662_v57 = vmul.f32 %v1769_v56, %v1769_v56  ;;  %v579_v61 = vpack.c.bf16 %v1769_v56, %v1769_v56 }
 0x1cd   : > { %828 = vrot.lane.b32.xlu2 %v662_v57, %s1987_s11  ;;  %1212 = vmatmul.msk.f32.vlgmr.msra.gmra.mxu3 %vm483_vm0, %v662_v57 }
 0x1d2   : > { %v1779_v58 = vpop.f32.mrf.mxu0 }
 0x1d3   : > { %770 = vrot.lane.b32.xlu1 %v1779_v58, %s1987_s11  ;;  %1208 = vmatmul.msk.f32.gmra.mxu1 %vm483_vm0, %v1779_v58  ;;  %v663_v59 = vmul.f32 %v1779_v58, %v1779_v58 }
 0x1d5   : > { %830 = vrot.lane.b32.xlu2 %v663_v59, %s1987_s11  ;;  %1213 = vmatmul.msk.f32.gmra.mxu3 %vm483_vm0, %v663_v59  ;;  %s1409_s11 = scalar_lea.hbm %s2019_s12, 32 }
 0x1db   : > { %943 = vrot.lane.b32.xlu1 %v1341_v60, %s1553_s23 }
 0x1e3   : > { %583 = vrot.lane.b32.xlu1 %v579_v61, %s1989_s30 }
 0x227   : > { %v829_v63 = vpop.permute.xlu2 %828 }
 0x228   : > { %1222 = vmatmul.msk.f32.vlgmr.msrb.gmra.mxu3 %vm483_vm0, %v829_v63 }
 0x22f   : > { %v831_v0 = vpop.permute.xlu2 %830 }
 0x230   : > { %1223 = vmatmul.msk.f32.gmra.mxu3 %vm483_vm0, %v831_v0 }
 0x23d   : > { %v769_v4 = vpop.permute.xlu0 %768 }
 0x245   : > { %v771_v1 = vpop.permute.xlu1 %770 }
 0x248   : > { %v622_v2 = vpop.f32.mrf.mxu1 }
 0x249   : > { %1210 = vmatmul.msk.f32.vlgmr.msrb.gmra.mxu0 %vm628_vm9, %v622_v2 }
 0x24d   : > { %v1809_v3 = vpop.permute.xlu1 %943 }
 0x250   : > { %v625_v5 = vpop.f32.mrf.mxu1  ;;  %v687_v7 = vpop.f32.mrf.mxu3 }
 0x251   : > { %1211 = vmatmul.msk.f32.vlgmr.msra.gmra.mxu2 %vm628_vm9, %v625_v5  ;;  %1217 = vmatmul.msk.f32.vlgmr.msra.gmra.mxu0 %vm483_vm0, %v769_v4 }
 0x252   : > { %1224 = vmatpush.msk.msra.mxu2 %vm635_vm8, %v596_v62 }
 0x255   : > { %v584_v6 = vpop.permute.xlu1 %583 }
 0x256   : > { %590 = vst.msk [vmem:[%s1818_s19] sm:$0xf] %vm589_vm10, %v584_v6 }
 0x258   : > { %v690_v8 = vpop.f32.mrf.mxu3 }
 0x259   : > { %1215 = vmatmul.msk.f32.vlgmr.msrb.gmra.mxu2 %vm628_vm9, %v687_v7  ;;  %1218 = vmatmul.msk.f32.gmra.mxu0 %vm483_vm0, %v771_v1 }
 0x261   : > { %1216 = vmatmul.msk.f32.gmra.mxu2 %vm628_vm9, %v690_v8 }
 0x2ab   : > { %v853_v9 = vpop.f32.mrf.mxu3 }
 0x2ac   : > { %1225 = vmatmul.msk.f32.vlgmr.msra.gmra.mxu2 %vm628_vm9, %v853_v9 }
 0x2b3   : > { %v856_v10 = vpop.f32.mrf.mxu3 }
 0x2b4   : > { %1226 = vmatmul.msk.f32.gmra.mxu2 %vm628_vm9, %v856_v10  ;;  %v1344_v10 = vld [vmem:[%s2017_s21] ss:$0 sm:$0xff]  ;;  %s984_s21 = scalar_lea.hbm %s2019_s12, %s1856_s15 }
 0x2b5   : > { %s987_s24 = sshll.u32 %s984_s21, 4  ;;  %s988_s24 = int_to_ptr.hbm [resolvable:$true] %s987_s24 }
 0x2b6   : > { %s1403_s14 = sshra.s32 %s988_s24, 4  ;;  %s1404_s14 = int_to_ptr.hbm [resolvable:$true] %s1403_s14 }
 0x2b7   : > { %p1410_p7 = scmp.lt.s32.totalorder %s1404_s14, %s2019_s12 }
 0x2c6   : > { %v656_v11 = vpop.f32.mrf.mxu0 }
 0x2c7   : > { %v722_v15 = vmul.f32 %v656_v11, %v656_v11  ;;  %v726_v31 = vsub.f32 %v1769_v56, %v656_v11 }
 0x2ce   : > { %v793_v12 = vpop.f32.mrf.mxu0 }
 0x2cf   : > { %1220 = vmatmul.msk.f32.vlgmr.msrb.gmra.mxu1 %vm628_vm9, %v793_v12 }
 0x2d4   : > { %v659_v13 = vpop.f32.mrf.mxu2 }
 0x2d5   : > { %v723_v19 = vmul.f32 %v659_v13, %v659_v13  ;;  %v727_v42 = vsub.f32 %v1779_v58, %v659_v13 }
 0x2d6   : > { %v796_v14 = vpop.f32.mrf.mxu0 }
 0x2d7   : > { %1221 = vmatmul.msk.f32.gmra.mxu1 %vm628_vm9, %v796_v14 }
 0x2dc   : > { %v716_v16 = vpop.f32.mrf.mxu2 }
 0x2dd   : > { %v724_v17 = vsub.f32 %v716_v16, %v722_v15 }
 0x2df   : > { %v728_v18 = vadd.f32 1e-06, %v724_v17 }
 0x2e1   : > { %1351 = vrsqrt.f32 %v728_v18  ;;  %vm736_vm12 = vweird.f32 %v728_v18 }
 0x2e4   : > { %v719_v20 = vpop.f32.mrf.mxu2 }
 0x2e5   : > { %v725_v21 = vsub.f32 %v719_v20, %v723_v19 }
 0x2e7   : > { %v1352_v22 = vpop.eup %1351  ;;  %v729_v23 = vadd.f32 1e-06, %v725_v21 }
 0x2e8   : > { %v731_v24 = vmul.f32 %v1352_v22, %v728_v18  ;;  %vm737_vm11 = vweird.f32 %v1352_v22 }
 0x2e9   : > { %1353 = vrsqrt.f32 %v729_v23  ;;  %vm738_vm13 = vmor %vm736_vm12, %vm737_vm11  ;;  %vm746_vm15 = vweird.f32 %v729_v23 }
 0x2ea   : > { %v732_v25 = vmul.f32 %v1352_v22, %v731_v24 }
 0x2ec   : > { %v733_v26 = vmul.f32 0.5, %v732_v25 }
 0x2ee   : > { %v734_v27 = vsub.f32 1.5, %v733_v26 }
 0x2ef   : > { %v1354_v28 = vpop.eup %1353 }
 0x2f0   : > { %v735_v29 = vmul.f32 %v1352_v22, %v734_v27  ;;  %v741_v30 = vmul.f32 %v1354_v28, %v729_v23  ;;  %vm747_vm14 = vweird.f32 %v1354_v28 }
 0x2f1   : > { %vm748_vm0 = vmor %vm746_vm15, %vm747_vm14 }
 0x2f2   : > { %v739_v33 = vsel %vm738_vm13, %v1352_v22, %v735_v29  ;;  %v742_v34 = vmul.f32 %v1354_v28, %v741_v30 }
 0x2f3   : > { %v750_v35 = vmul.f32 %v739_v33, %v726_v31 }
 0x2f4   : > { %v743_v37 = vmul.f32 0.5, %v742_v34 }
 0x2f5   : > { %v755_v38 = vmul.f32 %v1342_v32, %v750_v35 }
 0x2f6   : > { %v744_v39 = vsub.f32 1.5, %v743_v37 }
 0x2f7   : > { %v760_v40 = vadd.f32 %v1343_v36, %v755_v38 }
 0x2f8   : > { %v745_v41 = vmul.f32 %v1354_v28, %v744_v39 }
 0x2f9   : > { %v762_v43 = vpack.c.bf16 %v760_v40, %v760_v40 }
 0x2fa   : > { %v749_v44 = vsel %vm748_vm0, %v1354_v28, %v745_v41 }
 0x2fb   : > { %764 = vst.msk [vmem:[%s1838_s10] sm:$0xf] %vm589_vm10, %v762_v43  ;;  %v751_v45 = vmul.f32 %v749_v44, %v727_v42 }
 0x2fd   : > { %v756_v46 = vmul.f32 %v1342_v32, %v751_v45 }
 0x2ff   : > { %v761_v47 = vadd.f32 %v1343_v36, %v756_v46 }
 0x301   : > { %v763_v48 = vpack.c.bf16 %v761_v47, %v761_v47 }
 0x303   : > { %765 = vst.msk [vmem:[%s1838_s10 + $0x4] sm:$0xf] %vm589_vm10, %v763_v48  ;;  %s1405_s10 = scalar_lea.hbm %s1404_s14, 8 }
 0x304   : > { %p1406_p3 = scmp.ne.s32.totalorder %s1404_s14, %s1405_s10  ;;  %p1411_p8 = scmp.lt.s32.totalorder %s1409_s11, %s1405_s10 }
 0x306   : > { %p1407_p5 = pnand %p1406_p3, %p1690_p9  ;;  %p1412_p10 = por %p1411_p8, %p1410_p7 }
 0x308   : > { %p1408_p6 = pneg %p1407_p5 }
 0x30a   : > { %p1413_p11 = pnand %p1412_p10, %p1408_p6 }
 0x32f   : > { %v882_v49 = vpop.f32.mrf.mxu2 }
 0x337   : > { %v885_v57 = vpop.f32.mrf.mxu2 }
 0x34c   : > { %v822_v50 = vpop.f32.mrf.mxu1 }
 0x34d   : > { %v888_v51 = vmul.f32 %v822_v50, %v822_v50  ;;  %894 = vrot.lane.b32.xlu2 %v822_v50, %s1553_s23 }
 0x34f   : > { %v890_v52 = vsub.f32 %v882_v49, %v888_v51 }
 0x351   : > { %v902_v53 = vadd.f32 1e-06, %v890_v52 }
 0x353   : > { %1355 = vrsqrt.f32 %v902_v53  ;;  %vm910_vm2 = vweird.f32 %v902_v53 }
 0x354   : > { %v825_v54 = vpop.f32.mrf.mxu1 }
 0x355   : > { %v889_v55 = vmul.f32 %v825_v54, %v825_v54  ;;  %896 = vrot.lane.b32.xlu2 %v825_v54, %s1553_s23 }
 0x357   : > { %v891_v59 = vsub.f32 %v885_v57, %v889_v55 }
 0x359   : > { %v1356_v60 = vpop.eup %1355  ;;  %v903_v61 = vadd.f32 1e-06, %v891_v59 }
 0x35a   : > { %v905_v62 = vmul.f32 %v1356_v60, %v902_v53  ;;  %vm911_vm1 = vweird.f32 %v1356_v60 }
 0x35b   : > { %1357 = vrsqrt.f32 %v903_v61  ;;  %vm912_vm3 = vmor %vm910_vm2, %vm911_vm1  ;;  %vm920_vm5 = vweird.f32 %v903_v61 }
 0x35c   : > { %v906_v63 = vmul.f32 %v1356_v60, %v905_v62 }
 0x35e   : > { %v907_v0 = vmul.f32 0.5, %v906_v63 }
 0x360   : > { %v908_v1 = vsub.f32 1.5, %v907_v0 }
 0x361   : > { %v1358_v2 = vpop.eup %1357 }
 0x362   : > { %v915_v4 = vmul.f32 %v1358_v2, %v903_v61  ;;  %v909_v5 = vmul.f32 %v1356_v60, %v908_v1  ;;  %vm921_vm4 = vweird.f32 %v1358_v2 }
 0x363   : > { %vm922_vm6 = vmor %vm920_vm5, %vm921_vm4 }
 0x364   : > { %v913_v6 = vsel %vm912_vm3, %v1356_v60, %v909_v5  ;;  %v916_v7 = vmul.f32 %v1358_v2, %v915_v4 }
 0x365   : > { %926 = vrot.lane.b32.xlu2 %v913_v6, %s1553_s23 }
 0x366   : > { %v917_v8 = vmul.f32 0.5, %v916_v7 }
 0x368   : > { %v918_v9 = vsub.f32 1.5, %v917_v8 }
 0x36a   : > { %v919_v11 = vmul.f32 %v1358_v2, %v918_v9 }
 0x36c   : > { %v923_v12 = vsel %vm922_vm6, %v1358_v2, %v919_v11 }
 0x36d   : > { %936 = vrot.lane.b32.xlu2 %v1344_v10, %s1553_s23  ;;  %928 = vrot.lane.b32.xlu0 %v923_v12, %s1553_s23 }
 0x3a7   : > { %v895_v13 = vpop.permute.xlu2 %894 }
 0x3a8   : > { %v900_v16 = vsub.f32 %v1769_v56, %v895_v13 }
 0x3af   : > { %v897_v14 = vpop.permute.xlu2 %896 }
 0x3bf   : > { %v927_v15 = vpop.permute.xlu2 %926 }
 0x3c0   : > { %v932_v17 = vmul.f32 %v927_v15, %v900_v16 }
 0x3c7   : > { %v937_v18 = vpop.permute.xlu2 %936 }
 0x3c8   : > { %v939_v19 = vmul.f32 %v937_v18, %v932_v17 }
 0x3ca   : > { %v946_v20 = vadd.f32 %v1809_v3, %v939_v19 }
 0x3cc   : > { %v948_v21 = vpack.c.bf16 %v946_v20, %v946_v20 }
 0x3cd   : > { %1416 = shalt.err (!%p1413_p11)
}
 0x3ce   : > { %s1991_s7 = smov 4   ;;  %s2020_s23 = smov 64   ;;  %v580_v56 = vpack.c.bf16 %v1779_v58, %v1779_v58  ;;  %v901_v22 = vsub.f32 %v1779_v58, %v897_v14 }
 0x3cf   : > { %s2021_s29 = sld [smem:[#allocation15_spill]]  ;;  %s2022_s21 = smov 96  }
 0x3d0   : > { %1246 = dma.vmem_to_hbm [thread:$0]  (%p1690_p9), %s986_s16, 128, %s988_s24, %s961_s25, %s2020_s23, %s2020_s23, %s1991_s7  }
 0x3d1   : > { %952 = vrot.lane.b32.xlu0 %v948_v21, %s2022_s21  ;;  %s2023_s30 = sld [smem:[#allocation26_spill]]  ;;  %s466_s24 = scalar_lea.vmem [#allocation6], %s1812_s18 }
 0x3d2   : > { %s1004_s25 = sshll.u32 %s466_s24, 4  ;;  %s2024_s7 = sld [smem:[#allocation27_spill]]  ;;  %s1005_s25 = int_to_ptr.vmem [resolvable:$true] %s1004_s25 }
 0x3d5   : > { %s965_s14 = sand.u32 1, %s2021_s29  }
 0x3d6   : > { %s1899_s18 = scalar_lea.sflag [#allocation7], %s965_s14 }
 0x3d7   : > { %s1003_s16 = scalar_lea.hbm %s2023_s30, %s1856_s15  ;;  %s1437_s17 = scalar_lea.hbm %s2023_s30, 32 }
 0x3d8   : > { %s1006_s10 = sshll.u32 %s1003_s16, 4  ;;  %s1022_s1 = scalar_lea.hbm %s2024_s7, %s1856_s15  ;;  %s1007_s10 = int_to_ptr.hbm [resolvable:$true] %s1006_s10 }
 0x3d9   : > { %585 = vrot.lane.b32.xlu0 %v580_v56, %s2020_s23  ;;  %s1897_s0 = sshll.u32 %s1022_s1, 4  ;;  %s1431_s29 = sshra.s32 %s1007_s10, 4  ;;  %s1432_s29 = int_to_ptr.hbm [resolvable:$true] %s1431_s29  ;;  %s1026_s0 = int_to_ptr.hbm [resolvable:$true] %s1897_s0 }
 0x3da   : > { %s1433_s11 = scalar_lea.hbm %s1432_s29, 8  ;;  %p1438_p2 = scmp.lt.s32.totalorder %s1432_s29, %s2023_s30 }
 0x3db   : > { %p1434_p13 = scmp.ne.s32.totalorder %s1432_s29, %s1433_s11  ;;  %p1439_p4 = scmp.lt.s32.totalorder %s1437_s17, %s1433_s11 }
 0x3dd   : > { %p1435_p0 = pnand %p1434_p13, %p1690_p9  ;;  %p1440_p3 = por %p1439_p4, %p1438_p2 }
 0x3df   : > { %v929_v23 = vpop.permute.xlu0 %928  ;;  %p1436_p1 = pneg %p1435_p0 }
 0x3e0   : > { %v933_v24 = vmul.f32 %v929_v23, %v901_v22 }
 0x3e1   : > { %p1441_p5 = pnand %p1440_p3, %p1436_p1 }
 0x3e2   : > { %v940_v25 = vmul.f32 %v937_v18, %v933_v24 }
 0x3e4   : > { %v947_v26 = vadd.f32 %v1809_v3, %v940_v25 }
 0x3e6   : > { %v949_v27 = vpack.c.bf16 %v947_v26, %v947_v26 }
 0x3e8   : > { %954 = vrot.lane.b32.xlu2 %v949_v27, %s2022_s21  ;;  %s1023_s21 = sshll.u32 %s1818_s19, 4  ;;  %s1024_s21 = int_to_ptr.vmem [resolvable:$true] %s1023_s21 }
 0x442   : > { %v955_v3 = vpop.permute.xlu2 %954 }
 0x443   : > { %v953_v58 = vpop.permute.xlu0 %952  ;;  %959 = vst.msk [vmem:[%s466_s24 + $0x4] sm:$0xf] %vm589_vm10, %v955_v3 }
 0x444   : > { %958 = vst.msk [vmem:[%s466_s24] sm:$0xf] %vm589_vm10, %v953_v58 }
 0x445   : > { %1444 = shalt.err (!%p1441_p5)
}
 0x446   : > { %s2025_s1 = smov 4   ;;  %s1459_s2 = sshra.s32 %s1026_s0, 4  ;;  %s1460_s2 = int_to_ptr.hbm [resolvable:$true] %s1459_s2 }
 0x447   : > { %1247 = dma.vmem_to_hbm [thread:$0]  (%p1690_p9), %s1005_s25, 128, %s1007_s10, %s1899_s18, %s2020_s23, %s2020_s23, %s2025_s1  }
 0x448   : > { %s1461_s24 = scalar_lea.hbm %s1460_s2, 8  ;;  %s1465_s11 = scalar_lea.hbm %s2024_s7, 32 }
 0x449   : > { %p1462_p6 = scmp.ne.s32.totalorder %s1460_s2, %s1461_s24  ;;  %p1466_p10 = scmp.lt.s32.totalorder %s1460_s2, %s2024_s7 }
 0x44a   : > { %p1467_p11 = scmp.lt.s32.totalorder %s1465_s11, %s1461_s24 }
 0x44b   : > { %v586_v28 = vpop.permute.xlu0 %585  ;;  %p1463_p7 = pnand %p1462_p6, %p1690_p9 }
 0x44c   : > { %591 = vst.msk [vmem:[%s1818_s19 + $0x4] sm:$0xf] %vm589_vm10, %v586_v28  ;;  %p1468_p13 = por %p1467_p11, %p1466_p10 }
 0x44d   : > { %p1464_p8 = pneg %p1463_p7 }
 0x44f   : > { %p1469_p0 = pnand %p1468_p13, %p1464_p8 }
 0x451   : > { %1472 = shalt.err (!%p1469_p0)
}
 0x452   : > { %1248 = dma.vmem_to_hbm [thread:$0]  (%p1690_p9), %s1024_s21, 128, %s1026_s0, %s1899_s18, %s2020_s23, %s2020_s23, %s2025_s1  }
 0x453 PF: > { %s2026_s19 = sld [smem:[#allocation12_spill]]  ;;  %p1267_p1 = scmp.ge.s32.totalorder %s1547_s28, 2 }
 0x455   : > { %p1257_p2 = pnand %p1267_p1, %p1698_p12 }
 0x457   : > { %p1258_p4 = pneg %p1257_p2 }
 0x459   : > { %s1040_s10 = sand.u32 1, %s2026_s19  }
 0x45a   : > { %s1041_s17 = scalar_lea.sflag [#allocation4], %s1040_s10 }
 0x45b   : > { %1510 = dma.done.wait (%p1258_p4), %s1041_s17, 128  }
 0x45c   : > { %1512 = vsyncadd (%p1258_p4), %s1041_s17, 4294967168  ;;  %s2028_s13 = sadd.s32 4294967294, %s1547_s28  }
 0x45d   : > { %s1050_s20 = sand.u32 1, %s2028_s13  }
 0x45e   : > { %s1051_s2 = scalar_lea.sflag [#allocation7], %s1050_s20 }
 0x45f   : > { %1514 = dma.done.wait (%p1258_p4), %s1051_s2, 256  }
 0x460   : > { %1516 = vsyncadd (%p1258_p4), %s1051_s2, 4294967040  ;;  %s32_s28 = sadd.s32 1, %s1547_s28   ;;  %s2029_s23 = sld [smem:[#allocation13_spill]] }
 0x461   : > { %p29_p9 = scmp.ge.s32.totalorder %s32_s28, 6   ;;  %s2030_s0 = sld [smem:[#allocation20_spill]] }
 0x462   : > { %s2031_s18 = sld [smem:[#allocation16_spill]]  ;;  %s2033_s21 = smov %s1523_s22 }
 0x463   : > { %s2032_s1 = sld [smem:[#allocation17_spill]]  ;;  %s2036_s24 = smov %s1539_s26 }
 0x464   : > { %s2037_s25 = smov %s1543_s27 }
 0x465   :  { %31 = sbr.rel (!%p29_p9) target bundleno = 17 (0x11), region = 137 }
 0x466   : > { %s2034_s22 = smov %s2029_s23 }
 0x467   : > { %s2035_s23 = smov %s2030_s0 }
 0x468   : > { %s2038_s26 = smov %s2031_s18 }
 0x469   : > { %s2039_s27 = smov %s2032_s1 }
 0x46a   :  { %1067 = vsyncpa [#allocation3], 1 }
 0x46b   :  { %1069 = vsyncpa [#allocation3 + $0x1], 1 }
 0x46c   :  { %1070 = vsyncpa [#allocation4], 1 }
 0x46d   :  { %1072 = vsyncpa [#allocation4 + $0x1], 1 }
 0x46e   :  { %1073 = vsyncpa [#allocation7], 1 }
 0x46f   :  { %1075 = vsyncpa [#allocation7 + $0x1], 1 }

// kernel: tpu_custom_call.1
= control target key start
LH: loop header
LB: loop body
LE: loop exit
PB: predicated region body
PF: predicated region fallthrough
CT: control target
= control target key end

     0   :  { %s1962_s0 = inlined_call_operand.hbm [shape: f32[2,32,32], index: 0, kind: input, shape index: {}]   ;;  %s1963_s1 = inlined_call_operand.vmem [shape: f32[1,32], index: 1, kind: input, shape index: {}]   ;;  %s1964_s2 = inlined_call_operand.vmem [shape: f32[1,32], index: 2, kind: input, shape index: {}]   ;;  %s1965_s3 = inlined_call_operand.vmem [shape: f32[32,4], index: 3, kind: input, shape index: {}]   ;;  %s1966_s4 = inlined_call_operand.vmem [shape: f32[4,32], index: 4, kind: input, shape index: {}]   ;;  %s1967_s5 = inlined_call_operand.vmem [shape: f32[1,32], index: 5, kind: input, shape index: {}]   ;;  %s1968_s6 = inlined_call_operand.vmem [shape: f32[1,32], index: 6, kind: input, shape index: {}]   ;;  %s1969_s7 = inlined_call_operand.vmem [shape: f32[1,32], index: 7, kind: input, shape index: {}]   ;;  %s1970_s8 = inlined_call_operand.vmem [shape: f32[1,32], index: 8, kind: input, shape index: {}]   ;;  %s1971_s9 = inlined_call_operand.vmem [shape: bf16[32,96], index: 9, kind: input, shape index: {}]   ;;  %s1972_s10 = inlined_call_operand.hbm [shape: bf16[2,32,32], index: 10, kind: output, shape index: {0}]   ;;  %s1973_s11 = inlined_call_operand.hbm [shape: bf16[2,32,32], index: 11, kind: output, shape index: {1}]   ;;  %s1974_s12 = inlined_call_operand.hbm [shape: bf16[2,32,32], index: 12, kind: output, shape index: {2}]  }
   0x1   :  { %1993 = sst [smem:[#allocation21_spill]] %s1962_s0 }
   0x2   :  { %1994 = sst [smem:[#allocation22_spill]] %s1963_s1 }
   0x3   :  { %1995 = sst [smem:[#allocation23_spill]] %s1964_s2 }
   0x4   :  { %1996 = sst [smem:[#allocation24_spill]] %s1969_s7 }
   0x5   :  { %1997 = sst [smem:[#allocation25_spill]] %s1972_s10 }
   0x6   :  { %1998 = sst [smem:[#allocation26_spill]] %s1973_s11 }
   0x7   :  { %1999 = sst [smem:[#allocation27_spill]] %s1974_s12 }
   0x8   :  { %18 = vsyncpa [#allocation3], 0 }
   0x9   :  { %20 = vsyncpa [#allocation3 + $0x1], 0 }
   0xa   :  { %21 = vsyncpa [#allocation4], 0 }
   0xb   :  { %23 = vsyncpa [#allocation4 + $0x1], 0 }
   0xc   :  { %24 = vsyncpa [#allocation7], 0 }
   0xd   :  { %26 = vsyncpa [#allocation7 + $0x1], 0  ;;  %s1621_s21 = smov 0   ;;  %s1623_s22 = smov 0  }
   0xe   :  { %s1625_s23 = smov 0   ;;  %s1627_s24 = smov 0  }
   0xf   :  { %s1629_s25 = smov 0   ;;  %s1631_s26 = smov 0  }
  0x10   :  { %s1633_s27 = smov 0   ;;  %s1635_s28 = smov 0  }
  0x11 LB: > { %2000 = sst [smem:[#allocation12_spill]] %s1519_s21  ;;  %s1662_s29 = sadd.s32 4294967295, %s1547_s28   ;;  %s1547_s28 = sphi %s1635_s28, %s32_s28   ;;  %s1543_s27 = sphi %s1633_s27, %s2039_s27   ;;  %s1539_s26 = sphi %s1631_s26, %s2038_s26   ;;  %s1535_s25 = sphi %s1629_s25, %s2037_s25   ;;  %s1531_s24 = sphi %s1627_s24, %s2036_s24   ;;  %s1527_s23 = sphi %s1625_s23, %s2035_s23   ;;  %s1523_s22 = sphi %s1623_s22, %s2034_s22   ;;  %s1519_s21 = sphi %s1621_s21, %s2033_s21  }
  0x12   : > { %2001 = sst [smem:[#allocation13_spill]] %s1527_s23  ;;  %s1984_s30 = sadd.s32 4294967294, %s1547_s28  }
  0x13   : > { %2002 = sst [smem:[#allocation14_spill]] %s1535_s25  ;;  %s41_s13 = sadd.s32 1, %s1539_s26 }
  0x14   : > { %2003 = sst [smem:[#allocation15_spill]] %s1662_s29  ;;  %s44_s14 = sadd.s32 1, %s1543_s27 }
  0x15   : > { %p42_p0 = scmp.ge.s32.totalorder %s41_s13, 2  ;;  %s53_s15 = sadd.s32 1, %s1527_s23 }
  0x16   : > { %p60_p1 = scmp.ne.s32.totalorder %s1527_s23, %s1523_s22  ;;  %p61_p2 = scmp.eq.s32.totalorder %s1547_s28, 0 }
  0x17   : > { %s2041_s13 = smov (%p42_p0, %s41_s13), 0  ;;  %s2043_s14 = smov (!%p42_p0, %s44_s14), %s1543_s27 }
  0x18   : > { %2004 = sst [smem:[#allocation16_spill]] %s2041_s13  ;;  %s49_s16 = ssub.s32 %s1539_s26, %s2041_s13 }
  0x19   : > { %p1676_p3 = por %p61_p2, %p60_p1  ;;  %p46_p4 = scmp.ge.s32.totalorder %s2043_s14, 2 }
  0x1a   : > { %p66_p5 = scmp.ne.s32.totalorder %s1523_s22, %s1519_s21  ;;  %p67_p6 = scmp.eq.s32.totalorder %s1662_s29, 0 }
  0x1b   : > { %p281_p7 = scmp.eq.s32.totalorder %s1662_s29, 3  ;;  %s2045_s14 = smov (%p46_p4, %s2043_s14), 0 }
  0x1c   : > { %2006 = sst [smem:[#allocation17_spill]] %s2045_s14  ;;  %p1686_p8 = por %p67_p6, %p66_p5 }
  0x1d   : > { %p1690_p9 = por %p281_p7, %p60_p1  ;;  %s48_s20 = ssub.s32 %s1543_s27, %s2045_s14 }
  0x1e   : > { %p287_p10 = scmp.eq.s32.totalorder %s1984_s30, 3  ;;  %s50_s13 = sor.u32 %s49_s16, %s48_s20 }
  0x1f   : > { %s2008_s19 = scalar_select %p1690_p9, 1, 0 }
  0x20   : > { %p51_p11 = scmp.eq.s32.totalorder %s50_s13, 0  ;;  %p1698_p12 = por %p287_p10, %p66_p5 }
  0x21   : > { %2009 = sst [smem:[#allocation18_spill]] %s2008_s19  ;;  %p1266_p13 = scmp.lt.s32.totalorder %s1547_s28, 4 }
  0x22   : > { %s2010_s21 = scalar_select %p1698_p12, 1, 0 }
  0x23   : > { %s390_s12 = sand.u32 1, %s1527_s23   ;;  %s1190_s10 = sshll.u32 %s1539_s26, 1 }
  0x24   : > { %2011 = sst [smem:[#allocation19_spill]] %s2010_s21  ;;  %s1189_s29 = sshll.u32 %s390_s12, 4 }
  0x25   : > { %s1705_s11 = scalar_select %p51_p11, %s1527_s23, %s53_s15  }
  0x26   : > { %s1191_s7 = sshll.u32 %s1543_s27, 2  ;;  %s394_s19 = scalar_lea.vmem [#allocation2], %s1189_s29 }
  0x27   : > { %2012 = sst [smem:[#allocation20_spill]] %s1705_s11  ;;  %s404_s14 = sshll.u32 %s394_s19, 4  ;;  %s405_s14 = int_to_ptr.vmem [resolvable:$true] %s404_s14 }
  0x28   : > { %s399_s25 = sadd.s32 %s1191_s7, %s1190_s10  ;;  %p1253_p0 = pnand %p1266_p13, %p1676_p3 }
  0x29   : > { %s1192_s30 = sshll.u32 %s399_s25, 3  ;;  %s2013_s0 = sld [smem:[#allocation21_spill]] }
  0x2a   : > { %s391_s15 = scalar_lea.sflag [#allocation3], %s390_s12  ;;  %s1549_s11 = smov 128  }
  0x2b   : > { %s1550_s23 = smov 8   ;;  %p1193_p1 = scmp.ge.s32.totalorder %s1547_s28, 1 }
  0x2c   : > { %p412_p2 = scmp.lt.s32.totalorder %s1547_s28, 5 }
  0x2e   : > { %p413_p4 = pnand %p1193_p1, %p412_p2 }
  0x2f   : > { %s401_s20 = scalar_lea.hbm %s2013_s0, %s1192_s30  ;;  %s1717_s7 = sand.u32 (!%p413_p4), 1, %s1523_s22  }
  0x30   : > { %s402_s21 = sshll.u32 %s401_s20, 4  ;;  %416 = sbr.rel (%p413_p4) target bundleno = 1107 (0x453), region = 60  ;;  %s403_s21 = int_to_ptr.hbm [resolvable:$true] %s402_s21 }
  0x31   : > { %1255 = dma.hbm_to_vmem [thread:$0]  (!%p1253_p0), %s403_s21, 256, %s405_s14, %s391_s15, %s1549_s11, %s1549_s11, %s1550_s23  }
  0x32   : > { %s1194_s10 = sshll.u32 (!%p413_p4), %s1717_s7, 4  ;;  %s419_s25 = scalar_lea.sflag (!%p413_p4), [#allocation3], %s1717_s7 }
  0x33   : > { %s422_s29 = scalar_lea.vmem (!%p413_p4), [#allocation2], %s1194_s10 }
  0x35   : > { %1506 = dma.done.wait (%p1686_p8), %s419_s25, 256  }
  0x36   : > { %1508 = vsyncadd (%p1686_p8), %s419_s25, 4294967040  ;;  %vm483_vm0 = vcmask 261120   ;;  %v479_v0 = vld [vmem:[%s422_s29] sm:$0xff]  ;;  %v480_v2 = vld [vmem:[%s422_s29 + $0x8] sm:$0xff]  ;;  %v1551_v4 = vmov 32.0   ;;  %s2014_s1 = sld [smem:[#allocation22_spill]] }
  0x37   : > { %v484_v1 = vsel %vm483_vm0, %v479_v0, 0.0  ;;  %v487_v3 = vsel %vm483_vm0, %v480_v2, 0.0  ;;  %1345 = vrcp.f32 %v1551_v4  ;;  %v1242_v21 = vld [vmem:[%s1971_s9 + $0x8] sm:$0xff]  ;;  %v1241_v23 = vld [vmem:[%s1971_s9] sm:$0xff]  ;;  %v1738_v26 = vld [vmem:[%s1965_s3 + $0x18] sm:$0xff]  ;;  %s2015_s2 = sld [smem:[#allocation23_spill]] }
  0x38   : > { %485 = vadd.xlane.f32.xlu0 %v484_v1  ;;  %571 = vmatpush.bf16.msra.mxu0 %v1242_v21  ;;  %v1743_v27 = vld [vmem:[%s1965_s3 + $0x10] sm:$0xff]  ;;  %v1750_v30 = vld [vmem:[%s1965_s3 + $0x8] sm:$0xff]  ;;  %v592_v55 = vld [vmem:[%s1965_s3] sm:$0xff]  ;;  %s1987_s11 = smov 96   ;;  %s1553_s23 = smov 32   ;;  %vm635_vm8 = vcmask 1043456  }
  0x39   : > { %617 = vmatpush.msra.mxu1 %v1738_v26  ;;  %682 = vmatpush.msra.mxu3 %v1738_v26  ;;  %v1341_v60 = vld [vmem:[%s1970_s8] ss:$0 sm:$0xff]  ;;  %s1989_s30 = smov 64   ;;  %vm628_vm9 = vcmask 31744   ;;  %s1812_s18 = sshll.u32 %s1717_s7, 3  ;;  %vm589_vm10 = vcmask 257024  }
  0x3a   : > { %v596_v62 = vld [vmem:[%s1966_s4] sm:$0xf]  ;;  %s1818_s19 = scalar_lea.vmem [#allocation8], %s1812_s18  ;;  %s1838_s10 = scalar_lea.vmem [#allocation5], %s1812_s18 }
  0x3b   : > { %618 = vmatpush.msra.mxu1 %v1743_v27  ;;  %683 = vmatpush.msra.mxu3 %v1743_v27  ;;  %s2016_s25 = sld [smem:[#allocation14_spill]]  ;;  %s1230_s14 = sshll.u32 %s1531_s24, 1 }
  0x3c   : > { %572 = vmatpush.bf16.msra.mxu0 %v1241_v23  ;;  %v1339_v45 = vld [vmem:[%s2014_s1] ss:$0 sm:$0xff]  ;;  %1243 = vmatpush.msk.msra.mxu2 %vm635_vm8, %v596_v62  ;;  %s2017_s21 = sld [smem:[#allocation24_spill]]  ;;  %s985_s16 = sshll.u32 %s1838_s10, 4  ;;  %s986_s16 = int_to_ptr.vmem [resolvable:$true] %s985_s16 }
  0x3d   : > { %v1346_v5 = vpop.eup %1345  ;;  %619 = vmatpush.msra.mxu1 %v1750_v30  ;;  %684 = vmatpush.msra.mxu3 %v1750_v30  ;;  %v1340_v50 = vld [vmem:[%s2015_s2] ss:$0 sm:$0xff]  ;;  %s2019_s12 = sld [smem:[#allocation25_spill]] }
  0x3e   : > { %v491_v6 = vmul.f32 32.0, %v1346_v5  ;;  %vm495_vm1 = vweird.f32 %v1346_v5  ;;  %1214 = vmatpush.msk.msrb.mxu2 %vm635_vm8, %v596_v62 }
  0x3f   : > { %620 = vmatpush.msra.mxu1 %v592_v55  ;;  %685 = vmatpush.msra.mxu3 %v592_v55 }
  0x40   : > { %488 = vadd.xlane.f32.xlu0 %v487_v3  ;;  %v492_v7 = vsub.f32 1.0, %v491_v6  ;;  %1209 = vmatpush.msk.msrb.mxu0 %vm635_vm8, %v596_v62 }
  0x41   : > { %848 = vmatpush.msrb.mxu3 %v1738_v26  ;;  %1219 = vmatpush.msk.msrb.mxu1 %vm635_vm8, %v596_v62  ;;  %s1231_s17 = sshll.u32 %s2016_s25, 2  ;;  %s961_s25 = scalar_lea.sflag [#allocation4], %s1717_s7 }
  0x42   : > { %v493_v8 = vmul.f32 %v1346_v5, %v492_v7  ;;  %s982_s13 = sadd.s32 %s1231_s17, %s1230_s14 }
  0x43   : > { %849 = vmatpush.msrb.mxu3 %v1743_v27  ;;  %s1856_s15 = sshll.u32 %s982_s13, 2 }
  0x44   : > { %v494_v9 = vadd.f32 %v1346_v5, %v493_v8 }
  0x45   : > { %850 = vmatpush.msrb.mxu3 %v1750_v30 }
  0x46   : > { %v496_v10 = vsel %vm495_vm1, %v1346_v5, %v494_v9 }
  0x47   : > { %851 = vmatpush.msrb.mxu3 %v592_v55 }
  0xab   : > { %v486_v11 = vpop.xlane.xlu0 %485 }
  0xac   : > { %v497_v12 = vmul.f32 %v496_v10, %v486_v11 }
  0xae   : > { %v499_v13 = vsub.f32 %v479_v0, %v497_v12 }
  0xb0   : > { %v501_v14 = vmul.f32 %v499_v13, %v499_v13 }
  0xb2   : > { %v503_v15 = vsel %vm483_vm0, %v501_v14, 0.0 }
  0xb3   : > { %504 = vadd.xlane.f32.xlu1 %v503_v15  ;;  %v489_v16 = vpop.xlane.xlu0 %488 }
  0xb4   : > { %v498_v17 = vmul.f32 %v496_v10, %v489_v16 }
  0xb6   : > { %v500_v18 = vsub.f32 %v480_v2, %v498_v17 }
  0xb8   : > { %v502_v19 = vmul.f32 %v500_v18, %v500_v18 }
  0xba   : > { %v506_v20 = vsel %vm483_vm0, %v502_v19, 0.0 }
  0xbb   : > { %507 = vadd.xlane.f32.xlu1 %v506_v20 }
 0x126   : > { %v505_v22 = vpop.xlane.xlu1 %504 }
 0x127   : > { %v509_v24 = vmul.f32 %v505_v22, %v496_v10 }
 0x129   : > { %v511_v25 = vadd.f32 1e-06, %v509_v24 }
 0x12b   : > { %1347 = vrsqrt.f32 %v511_v25  ;;  %vm519_vm3 = vweird.f32 %v511_v25 }
 0x12e   : > { %v508_v28 = vpop.xlane.xlu1 %507 }
 0x12f   : > { %v510_v29 = vmul.f32 %v508_v28, %v496_v10 }
 0x131   : > { %v1348_v31 = vpop.eup %1347  ;;  %v512_v32 = vadd.f32 1e-06, %v510_v29 }
 0x132   : > { %v514_v33 = vmul.f32 %v1348_v31, %v511_v25  ;;  %vm520_vm2 = vweird.f32 %v1348_v31 }
 0x133   : > { %1349 = vrsqrt.f32 %v512_v32  ;;  %vm521_vm4 = vmor %vm519_vm3, %vm520_vm2  ;;  %vm529_vm6 = vweird.f32 %v512_v32 }
 0x134   : > { %v515_v34 = vmul.f32 %v1348_v31, %v514_v33 }
 0x136   : > { %v516_v35 = vmul.f32 0.5, %v515_v34 }
 0x138   : > { %v517_v36 = vsub.f32 1.5, %v516_v35 }
 0x139   : > { %v1350_v37 = vpop.eup %1349 }
 0x13a   : > { %v518_v38 = vmul.f32 %v1348_v31, %v517_v36  ;;  %v524_v39 = vmul.f32 %v1350_v37, %v512_v32  ;;  %vm530_vm5 = vweird.f32 %v1350_v37  ;;  %v1342_v32 = vld [vmem:[%s1967_s5] ss:$0 sm:$0xff] }
 0x13b   : > { %vm531_vm7 = vmor %vm529_vm6, %vm530_vm5  ;;  %v1343_v36 = vld [vmem:[%s1968_s6] ss:$0 sm:$0xff] }
 0x13c   : > { %v525_v40 = vmul.f32 %v1350_v37, %v524_v39  ;;  %v522_v41 = vsel %vm521_vm4, %v1348_v31, %v518_v38 }
 0x13d   : > { %v533_v44 = vmul.f32 %v522_v41, %v499_v13 }
 0x13e   : > { %v526_v42 = vmul.f32 0.5, %v525_v40 }
 0x13f   : > { %v538_v49 = vmul.f32 %v1339_v45, %v533_v44 }
 0x140   : > { %v527_v43 = vsub.f32 1.5, %v526_v42 }
 0x141   : > { %v543_v52 = vadd.f32 %v1340_v50, %v538_v49 }
 0x142   : > { %v528_v46 = vmul.f32 %v1350_v37, %v527_v43 }
 0x144   : > { %v532_v47 = vsel %vm531_vm7, %v1350_v37, %v528_v46 }
 0x145   : > { %v534_v48 = vmul.f32 %v532_v47, %v500_v18 }
 0x147   : > { %v539_v51 = vmul.f32 %v1339_v45, %v534_v48 }
 0x149   : > { %v544_v53 = vadd.f32 %v1340_v50, %v539_v51 }
 0x14b   : > { %v545_v54 = vpack.c.bf16 %v544_v53, %v543_v52 }
 0x14d   : > { %1206 = vmatmul.msk.bf16.vlgmr.msra.gmra.mxu0 %vm483_vm0, %v545_v54 }
 0x14e   : > { %788 = vmatpush.msra.mxu0 %v1738_v26 }
 0x150   : > { %789 = vmatpush.msra.mxu0 %v1743_v27 }
 0x152   : > { %790 = vmatpush.msra.mxu0 %v1750_v30 }
 0x154   : > { %791 = vmatpush.msra.mxu0 %v592_v55 }
 0x1ca   : > { %v1769_v56 = vpop.f32.mrf.mxu0 }
 0x1cb   : > { %768 = vrot.lane.b32.xlu0 %v1769_v56, %s1987_s11  ;;  %1207 = vmatmul.msk.f32.vlgmr.msra.gmra.mxu1 %vm483_vm0, %v1769_v56  ;;  %v662_v57 = vmul.f32 %v1769_v56, %v1769_v56  ;;  %v579_v61 = vpack.c.bf16 %v1769_v56, %v1769_v56 }
 0x1cd   : > { %828 = vrot.lane.b32.xlu2 %v662_v57, %s1987_s11  ;;  %1212 = vmatmul.msk.f32.vlgmr.msra.gmra.mxu3 %vm483_vm0, %v662_v57 }
 0x1d2   : > { %v1779_v58 = vpop.f32.mrf.mxu0 }
 0x1d3   : > { %770 = vrot.lane.b32.xlu1 %v1779_v58, %s1987_s11  ;;  %1208 = vmatmul.msk.f32.gmra.mxu1 %vm483_vm0, %v1779_v58  ;;  %v663_v59 = vmul.f32 %v1779_v58, %v1779_v58 }
 0x1d5   : > { %830 = vrot.lane.b32.xlu2 %v663_v59, %s1987_s11  ;;  %1213 = vmatmul.msk.f32.gmra.mxu3 %vm483_vm0, %v663_v59  ;;  %s1409_s11 = scalar_lea.hbm %s2019_s12, 32 }
 0x1db   : > { %943 = vrot.lane.b32.xlu1 %v1341_v60, %s1553_s23 }
 0x1e3   : > { %583 = vrot.lane.b32.xlu1 %v579_v61, %s1989_s30 }
 0x227   : > { %v829_v63 = vpop.permute.xlu2 %828 }
 0x228   : > { %1222 = vmatmul.msk.f32.vlgmr.msrb.gmra.mxu3 %vm483_vm0, %v829_v63 }
 0x22f   : > { %v831_v0 = vpop.permute.xlu2 %830 }
 0x230   : > { %1223 = vmatmul.msk.f32.gmra.mxu3 %vm483_vm0, %v831_v0 }
 0x23d   : > { %v769_v4 = vpop.permute.xlu0 %768 }
 0x245   : > { %v771_v1 = vpop.permute.xlu1 %770 }
 0x248   : > { %v622_v2 = vpop.f32.mrf.mxu1 }
 0x249   : > { %1210 = vmatmul.msk.f32.vlgmr.msrb.gmra.mxu0 %vm628_vm9, %v622_v2 }
 0x24d   : > { %v1809_v3 = vpop.permute.xlu1 %943 }
 0x250   : > { %v625_v5 = vpop.f32.mrf.mxu1  ;;  %v687_v7 = vpop.f32.mrf.mxu3 }
 0x251   : > { %1211 = vmatmul.msk.f32.vlgmr.msra.gmra.mxu2 %vm628_vm9, %v625_v5  ;;  %1217 = vmatmul.msk.f32.vlgmr.msra.gmra.mxu0 %vm483_vm0, %v769_v4 }
 0x252   : > { %1224 = vmatpush.msk.msra.mxu2 %vm635_vm8, %v596_v62 }
 0x255   : > { %v584_v6 = vpop.permute.xlu1 %583 }
 0x256   : > { %590 = vst.msk [vmem:[%s1818_s19] sm:$0xf] %vm589_vm10, %v584_v6 }
 0x258   : > { %v690_v8 = vpop.f32.mrf.mxu3 }
 0x259   : > { %1215 = vmatmul.msk.f32.vlgmr.msrb.gmra.mxu2 %vm628_vm9, %v687_v7  ;;  %1218 = vmatmul.msk.f32.gmra.mxu0 %vm483_vm0, %v771_v1 }
 0x261   : > { %1216 = vmatmul.msk.f32.gmra.mxu2 %vm628_vm9, %v690_v8 }
 0x2ab   : > { %v853_v9 = vpop.f32.mrf.mxu3 }
 0x2ac   : > { %1225 = vmatmul.msk.f32.vlgmr.msra.gmra.mxu2 %vm628_vm9, %v853_v9 }
 0x2b3   : > { %v856_v10 = vpop.f32.mrf.mxu3 }
 0x2b4   : > { %1226 = vmatmul.msk.f32.gmra.mxu2 %vm628_vm9, %v856_v10  ;;  %v1344_v10 = vld [vmem:[%s2017_s21] ss:$0 sm:$0xff]  ;;  %s984_s21 = scalar_lea.hbm %s2019_s12, %s1856_s15 }
 0x2b5   : > { %s987_s24 = sshll.u32 %s984_s21, 4  ;;  %s988_s24 = int_to_ptr.hbm [resolvable:$true] %s987_s24 }
 0x2b6   : > { %s1403_s14 = sshra.s32 %s988_s24, 4  ;;  %s1404_s14 = int_to_ptr.hbm [resolvable:$true] %s1403_s14 }
 0x2b7   : > { %p1410_p7 = scmp.lt.s32.totalorder %s1404_s14, %s2019_s12 }
 0x2c6   : > { %v656_v11 = vpop.f32.mrf.mxu0 }
 0x2c7   : > { %v722_v15 = vmul.f32 %v656_v11, %v656_v11  ;;  %v726_v31 = vsub.f32 %v1769_v56, %v656_v11 }
 0x2ce   : > { %v793_v12 = vpop.f32.mrf.mxu0 }
 0x2cf   : > { %1220 = vmatmul.msk.f32.vlgmr.msrb.gmra.mxu1 %vm628_vm9, %v793_v12 }
 0x2d4   : > { %v659_v13 = vpop.f32.mrf.mxu2 }
 0x2d5   : > { %v723_v19 = vmul.f32 %v659_v13, %v659_v13  ;;  %v727_v42 = vsub.f32 %v1779_v58, %v659_v13 }
 0x2d6   : > { %v796_v14 = vpop.f32.mrf.mxu0 }
 0x2d7   : > { %1221 = vmatmul.msk.f32.gmra.mxu1 %vm628_vm9, %v796_v14 }
 0x2dc   : > { %v716_v16 = vpop.f32.mrf.mxu2 }
 0x2dd   : > { %v724_v17 = vsub.f32 %v716_v16, %v722_v15 }
 0x2df   : > { %v728_v18 = vadd.f32 1e-06, %v724_v17 }
 0x2e1   : > { %1351 = vrsqrt.f32 %v728_v18  ;;  %vm736_vm12 = vweird.f32 %v728_v18 }
 0x2e4   : > { %v719_v20 = vpop.f32.mrf.mxu2 }
 0x2e5   : > { %v725_v21 = vsub.f32 %v719_v20, %v723_v19 }
 0x2e7   : > { %v1352_v22 = vpop.eup %1351  ;;  %v729_v23 = vadd.f32 1e-06, %v725_v21 }
 0x2e8   : > { %v731_v24 = vmul.f32 %v1352_v22, %v728_v18  ;;  %vm737_vm11 = vweird.f32 %v1352_v22 }
 0x2e9   : > { %1353 = vrsqrt.f32 %v729_v23  ;;  %vm738_vm13 = vmor %vm736_vm12, %vm737_vm11  ;;  %vm746_vm15 = vweird.f32 %v729_v23 }
 0x2ea   : > { %v732_v25 = vmul.f32 %v1352_v22, %v731_v24 }
 0x2ec   : > { %v733_v26 = vmul.f32 0.5, %v732_v25 }
 0x2ee   : > { %v734_v27 = vsub.f32 1.5, %v733_v26 }
 0x2ef   : > { %v1354_v28 = vpop.eup %1353 }
 0x2f0   : > { %v735_v29 = vmul.f32 %v1352_v22, %v734_v27  ;;  %v741_v30 = vmul.f32 %v1354_v28, %v729_v23  ;;  %vm747_vm14 = vweird.f32 %v1354_v28 }
 0x2f1   : > { %vm748_vm0 = vmor %vm746_vm15, %vm747_vm14 }
 0x2f2   : > { %v739_v33 = vsel %vm738_vm13, %v1352_v22, %v735_v29  ;;  %v742_v34 = vmul.f32 %v1354_v28, %v741_v30 }
 0x2f3   : > { %v750_v35 = vmul.f32 %v739_v33, %v726_v31 }
 0x2f4   : > { %v743_v37 = vmul.f32 0.5, %v742_v34 }
 0x2f5   : > { %v755_v38 = vmul.f32 %v1342_v32, %v750_v35 }
 0x2f6   : > { %v744_v39 = vsub.f32 1.5, %v743_v37 }
 0x2f7   : > { %v760_v40 = vadd.f32 %v1343_v36, %v755_v38 }
 0x2f8   : > { %v745_v41 = vmul.f32 %v1354_v28, %v744_v39 }
 0x2f9   : > { %v762_v43 = vpack.c.bf16 %v760_v40, %v760_v40 }
 0x2fa   : > { %v749_v44 = vsel %vm748_vm0, %v1354_v28, %v745_v41 }
 0x2fb   : > { %764 = vst.msk [vmem:[%s1838_s10] sm:$0xf] %vm589_vm10, %v762_v43  ;;  %v751_v45 = vmul.f32 %v749_v44, %v727_v42 }
 0x2fd   : > { %v756_v46 = vmul.f32 %v1342_v32, %v751_v45 }
 0x2ff   : > { %v761_v47 = vadd.f32 %v1343_v36, %v756_v46 }
 0x301   : > { %v763_v48 = vpack.c.bf16 %v761_v47, %v761_v47 }
 0x303   : > { %765 = vst.msk [vmem:[%s1838_s10 + $0x4] sm:$0xf] %vm589_vm10, %v763_v48  ;;  %s1405_s10 = scalar_lea.hbm %s1404_s14, 8 }
 0x304   : > { %p1406_p3 = scmp.ne.s32.totalorder %s1404_s14, %s1405_s10  ;;  %p1411_p8 = scmp.lt.s32.totalorder %s1409_s11, %s1405_s10 }
 0x306   : > { %p1407_p5 = pnand %p1406_p3, %p1690_p9  ;;  %p1412_p10 = por %p1411_p8, %p1410_p7 }
 0x308   : > { %p1408_p6 = pneg %p1407_p5 }
 0x30a   : > { %p1413_p11 = pnand %p1412_p10, %p1408_p6 }
 0x32f   : > { %v882_v49 = vpop.f32.mrf.mxu2 }
 0x337   : > { %v885_v57 = vpop.f32.mrf.mxu2 }
 0x34c   : > { %v822_v50 = vpop.f32.mrf.mxu1 }
 0x34d   : > { %v888_v51 = vmul.f32 %v822_v50, %v822_v50  ;;  %894 = vrot.lane.b32.xlu2 %v822_v50, %s1553_s23 }
 0x34f   : > { %v890_v52 = vsub.f32 %v882_v49, %v888_v51 }
 0x351   : > { %v902_v53 = vadd.f32 1e-06, %v890_v52 }
 0x353   : > { %1355 = vrsqrt.f32 %v902_v53  ;;  %vm910_vm2 = vweird.f32 %v902_v53 }
 0x354   : > { %v825_v54 = vpop.f32.mrf.mxu1 }
 0x355   : > { %v889_v55 = vmul.f32 %v825_v54, %v825_v54  ;;  %896 = vrot.lane.b32.xlu2 %v825_v54, %s1553_s23 }
 0x357   : > { %v891_v59 = vsub.f32 %v885_v57, %v889_v55 }
 0x359   : > { %v1356_v60 = vpop.eup %1355  ;;  %v903_v61 = vadd.f32 1e-06, %v891_v59 }
 0x35a   : > { %v905_v62 = vmul.f32 %v1356_v60, %v902_v53  ;;  %vm911_vm1 = vweird.f32 %v1356_v60 }
 0x35b   : > { %1357 = vrsqrt.f32 %v903_v61  ;;  %vm912_vm3 = vmor %vm910_vm2, %vm911_vm1  ;;  %vm920_vm5 = vweird.f32 %v903_v61 }
 0x35c   : > { %v906_v63 = vmul.f32 %v1356_v60, %v905_v62 }
 0x35e   : > { %v907_v0 = vmul.f32 0.5, %v906_v63 }
 0x360   : > { %v908_v1 = vsub.f32 1.5, %v907_v0 }
 0x361   : > { %v1358_v2 = vpop.eup %1357 }
 0x362   : > { %v915_v4 = vmul.f32 %v1358_v2, %v903_v61  ;;  %v909_v5 = vmul.f32 %v1356_v60, %v908_v1  ;;  %vm921_vm4 = vweird.f32 %v1358_v2 }
 0x363   : > { %vm922_vm6 = vmor %vm920_vm5, %vm921_vm4 }
 0x364   : > { %v913_v6 = vsel %vm912_vm3, %v1356_v60, %v909_v5  ;;  %v916_v7 = vmul.f32 %v1358_v2, %v915_v4 }
 0x365   : > { %926 = vrot.lane.b32.xlu2 %v913_v6, %s1553_s23 }
 0x366   : > { %v917_v8 = vmul.f32 0.5, %v916_v7 }
 0x368   : > { %v918_v9 = vsub.f32 1.5, %v917_v8 }
 0x36a   : > { %v919_v11 = vmul.f32 %v1358_v2, %v918_v9 }
 0x36c   : > { %v923_v12 = vsel %vm922_vm6, %v1358_v2, %v919_v11 }
 0x36d   : > { %936 = vrot.lane.b32.xlu2 %v1344_v10, %s1553_s23  ;;  %928 = vrot.lane.b32.xlu0 %v923_v12, %s1553_s23 }
 0x3a7   : > { %v895_v13 = vpop.permute.xlu2 %894 }
 0x3a8   : > { %v900_v16 = vsub.f32 %v1769_v56, %v895_v13 }
 0x3af   : > { %v897_v14 = vpop.permute.xlu2 %896 }
 0x3bf   : > { %v927_v15 = vpop.permute.xlu2 %926 }
 0x3c0   : > { %v932_v17 = vmul.f32 %v927_v15, %v900_v16 }
 0x3c7   : > { %v937_v18 = vpop.permute.xlu2 %936 }
 0x3c8   : > { %v939_v19 = vmul.f32 %v937_v18, %v932_v17 }
 0x3ca   : > { %v946_v20 = vadd.f32 %v1809_v3, %v939_v19 }
 0x3cc   : > { %v948_v21 = vpack.c.bf16 %v946_v20, %v946_v20 }
 0x3cd   : > { %1416 = shalt.err (!%p1413_p11)
}
 0x3ce   : > { %s1991_s7 = smov 4   ;;  %s2020_s23 = smov 64   ;;  %v580_v56 = vpack.c.bf16 %v1779_v58, %v1779_v58  ;;  %v901_v22 = vsub.f32 %v1779_v58, %v897_v14 }
 0x3cf   : > { %s2021_s29 = sld [smem:[#allocation15_spill]]  ;;  %s2022_s21 = smov 96  }
 0x3d0   : > { %1246 = dma.vmem_to_hbm [thread:$0]  (%p1690_p9), %s986_s16, 128, %s988_s24, %s961_s25, %s2020_s23, %s2020_s23, %s1991_s7  }
 0x3d1   : > { %952 = vrot.lane.b32.xlu0 %v948_v21, %s2022_s21  ;;  %s2023_s30 = sld [smem:[#allocation26_spill]]  ;;  %s466_s24 = scalar_lea.vmem [#allocation6], %s1812_s18 }
 0x3d2   : > { %s1004_s25 = sshll.u32 %s466_s24, 4  ;;  %s2024_s7 = sld [smem:[#allocation27_spill]]  ;;  %s1005_s25 = int_to_ptr.vmem [resolvable:$true] %s1004_s25 }
 0x3d5   : > { %s965_s14 = sand.u32 1, %s2021_s29  }
 0x3d6   : > { %s1899_s18 = scalar_lea.sflag [#allocation7], %s965_s14 }
 0x3d7   : > { %s1003_s16 = scalar_lea.hbm %s2023_s30, %s1856_s15  ;;  %s1437_s17 = scalar_lea.hbm %s2023_s30, 32 }
 0x3d8   : > { %s1006_s10 = sshll.u32 %s1003_s16, 4  ;;  %s1022_s1 = scalar_lea.hbm %s2024_s7, %s1856_s15  ;;  %s1007_s10 = int_to_ptr.hbm [resolvable:$true] %s1006_s10 }
 0x3d9   : > { %585 = vrot.lane.b32.xlu0 %v580_v56, %s2020_s23  ;;  %s1897_s0 = sshll.u32 %s1022_s1, 4  ;;  %s1431_s29 = sshra.s32 %s1007_s10, 4  ;;  %s1432_s29 = int_to_ptr.hbm [resolvable:$true] %s1431_s29  ;;  %s1026_s0 = int_to_ptr.hbm [resolvable:$true] %s1897_s0 }
 0x3da   : > { %s1433_s11 = scalar_lea.hbm %s1432_s29, 8  ;;  %p1438_p2 = scmp.lt.s32.totalorder %s1432_s29, %s2023_s30 }
 0x3db   : > { %p1434_p13 = scmp.ne.s32.totalorder %s1432_s29, %s1433_s11  ;;  %p1439_p4 = scmp.lt.s32.totalorder %s1437_s17, %s1433_s11 }
 0x3dd   : > { %p1435_p0 = pnand %p1434_p13, %p1690_p9  ;;  %p1440_p3 = por %p1439_p4, %p1438_p2 }
 0x3df   : > { %v929_v23 = vpop.permute.xlu0 %928  ;;  %p1436_p1 = pneg %p1435_p0 }
 0x3e0   : > { %v933_v24 = vmul.f32 %v929_v23, %v901_v22 }
 0x3e1   : > { %p1441_p5 = pnand %p1440_p3, %p1436_p1 }
 0x3e2   : > { %v940_v25 = vmul.f32 %v937_v18, %v933_v24 }
 0x3e4   : > { %v947_v26 = vadd.f32 %v1809_v3, %v940_v25 }
 0x3e6   : > { %v949_v27 = vpack.c.bf16 %v947_v26, %v947_v26 }
 0x3e8   : > { %954 = vrot.lane.b32.xlu2 %v949_v27, %s2022_s21  ;;  %s1023_s21 = sshll.u32 %s1818_s19, 4  ;;  %s1024_s21 = int_to_ptr.vmem [resolvable:$true] %s1023_s21 }
 0x442   : > { %v955_v3 = vpop.permute.xlu2 %954 }
 0x443   : > { %v953_v58 = vpop.permute.xlu0 %952  ;;  %959 = vst.msk [vmem:[%s466_s24 + $0x4] sm:$0xf] %vm589_vm10, %v955_v3 }
 0x444   : > { %958 = vst.msk [vmem:[%s466_s24] sm:$0xf] %vm589_vm10, %v953_v58 }
 0x445   : > { %1444 = shalt.err (!%p1441_p5)
}
 0x446   : > { %s2025_s1 = smov 4   ;;  %s1459_s2 = sshra.s32 %s1026_s0, 4  ;;  %s1460_s2 = int_to_ptr.hbm [resolvable:$true] %s1459_s2 }
 0x447   : > { %1247 = dma.vmem_to_hbm [thread:$0]  (%p1690_p9), %s1005_s25, 128, %s1007_s10, %s1899_s18, %s2020_s23, %s2020_s23, %s2025_s1  }
 0x448   : > { %s1461_s24 = scalar_lea.hbm %s1460_s2, 8  ;;  %s1465_s11 = scalar_lea.hbm %s2024_s7, 32 }
 0x449   : > { %p1462_p6 = scmp.ne.s32.totalorder %s1460_s2, %s1461_s24  ;;  %p1466_p10 = scmp.lt.s32.totalorder %s1460_s2, %s2024_s7 }
 0x44a   : > { %p1467_p11 = scmp.lt.s32.totalorder %s1465_s11, %s1461_s24 }
 0x44b   : > { %v586_v28 = vpop.permute.xlu0 %585  ;;  %p1463_p7 = pnand %p1462_p6, %p1690_p9 }
 0x44c   : > { %591 = vst.msk [vmem:[%s1818_s19 + $0x4] sm:$0xf] %vm589_vm10, %v586_v28  ;;  %p1468_p13 = por %p1467_p11, %p1466_p10 }
 0x44d   : > { %p1464_p8 = pneg %p1463_p7 }
 0x44f   : > { %p1469_p0 = pnand %p1468_p13, %p1464_p8 }
 0x451   : > { %1472 = shalt.err (!%p1469_p0)
}
 0x452   : > { %1248 = dma.vmem_to_hbm [thread:$0]  (%p1690_p9), %s1024_s21, 128, %s1026_s0, %s1899_s18, %s2020_s23, %s2020_s23, %s2025_s1  }
 0x453 PF: > { %s2026_s19 = sld [smem:[#allocation12_spill]]  ;;  %p1267_p1 = scmp.ge.s32.totalorder %s1547_s28, 2 }
 0x455   : > { %p1257_p2 = pnand %p1267_p1, %p1698_p12 }
 0x457   : > { %p1258_p4 = pneg %p1257_p2 }
 0x459   : > { %s1040_s10 = sand.u32 1, %s2026_s19  }
 0x45a   : > { %s1041_s17 = scalar_lea.sflag [#allocation4], %s1040_s10 }
 0x45b   : > { %1510 = dma.done.wait (%p1258_p4), %s1041_s17, 128  }
 0x45c   : > { %1512 = vsyncadd (%p1258_p4), %s1041_s17, 4294967168  ;;  %s2028_s13 = sadd.s32 4294967294, %s1547_s28  }
 0x45d   : > { %s1050_s20 = sand.u32 1, %s2028_s13  }
 0x45e   : > { %s1051_s2 = scalar_lea.sflag [#allocation7], %s1050_s20 }
 0x45f   : > { %1514 = dma.done.wait (%p1258_p4), %s1051_s2, 256  }
 0x460   : > { %1516 = vsyncadd (%p1258_p4), %s1051_s2, 4294967040  ;;  %s32_s28 = sadd.s32 1, %s1547_s28   ;;  %s2029_s23 = sld [smem:[#allocation13_spill]] }
 0x461   : > { %p29_p9 = scmp.ge.s32.totalorder %s32_s28, 6   ;;  %s2030_s0 = sld [smem:[#allocation20_spill]] }
 0x462   : > { %s2031_s18 = sld [smem:[#allocation16_spill]]  ;;  %s2033_s21 = smov %s1523_s22 }
 0x463   : > { %s2032_s1 = sld [smem:[#allocation17_spill]]  ;;  %s2036_s24 = smov %s1539_s26 }
 0x464   : > { %s2037_s25 = smov %s1543_s27 }
 0x465   :  { %31 = sbr.rel (!%p29_p9) target bundleno = 17 (0x11), region = 137 }
 0x466   : > { %s2034_s22 = smov %s2029_s23 }
 0x467   : > { %s2035_s23 = smov %s2030_s0 }
 0x468   : > { %s2038_s26 = smov %s2031_s18 }
 0x469   : > { %s2039_s27 = smov %s2032_s1 }
 0x46a   :  { %1067 = vsyncpa [#allocation3], 1 }
 0x46b   :  { %1069 = vsyncpa [#allocation3 + $0x1], 1 }
 0x46c   :  { %1070 = vsyncpa [#allocation4], 1 }
 0x46d   :  { %1072 = vsyncpa [#allocation4 + $0x1], 1 }
 0x46e   :  { %1073 = vsyncpa [#allocation7], 1 }
 0x46f   :  { %1075 = vsyncpa [#allocation7 + $0x1], 1 }

</bundles_post_ra>
